<compile_context>
chip_gen: v6e
topology: v6e:2x2x1
jax: 0.10.0
libtpu: 0.0.40
codegen_flags: <defaults>
</compile_context>

<pallas_src>
import functools

import jax
import jax.numpy as jnp
from jax.experimental import pallas as pl
from jax.experimental.pallas import tpu as pltpu


# ---------------------------------------------------------------------------
# Helpers.
# ---------------------------------------------------------------------------
def _round_up(x, m):
    return ((x + m - 1) // m) * m


def _vmem_limit_kwargs():
    """Generation-aware scoped-VMEM limit with ~30% headroom (never request the
    full physical VMEM -- 64 MiB is everything on v7x).  Omitted if unknown."""
    try:
        cap = pltpu.get_tpu_info().vmem_capacity_bytes
        return {"vmem_limit_bytes": int(cap * 0.7)}
    except Exception:
        return {}


def _pick_tn(cout_pad, n_batch):
    """Output-channel tile: prefer a fully VMEM-resident weight (one N block),
    but keep >= 2 parallel grid blocks so both v7x TensorCores get work."""
    candidates = [c for c in (512, 384, 256, 128)
                  if c <= cout_pad and cout_pad % c == 0]
    tn = candidates[0] if candidates else cout_pad
    if n_batch * (cout_pad // tn) < 2:
        for c in candidates:
            if cout_pad // c >= 2:
                tn = c
                break
    return tn


# ---------------------------------------------------------------------------
# Fused stride-1 conv kernel (implicit im2col, weights VMEM-resident).
# ---------------------------------------------------------------------------
def _fused_conv_kernel(x_ref, w_ref, b_ref, o_ref, *, offsets, m_rows):
    """x_ref: (1, L, Cin) bf16   spatially padded, (h*w)-flattened NHWC input
       w_ref: (kh*kw, Cin, tn) bf16   per-tap weight matrices (resident)
       b_ref: (1, tn) f32
       o_ref: (1, m_rows, tn) f32   (hout * w_pad)-flattened output block"""
    tn = o_ref.shape[-1]
    acc = jnp.zeros((m_rows, tn), jnp.float32)
    # Static unroll over the kh*kw taps: each tap is a shifted, contiguous view
    # of the resident input slab feeding one accumulating MXU matmul.
    for idx, off in enumerate(offsets):
        a = x_ref[0, pl.ds(off, m_rows), :]
        acc = acc + jnp.dot(a, w_ref[idx], preferred_element_type=jnp.float32)
    o_ref[0] = (acc + b_ref[...]).astype(o_ref.dtype)


def conv2d_stride1_fused(x_nhwc, w_kk, bias_p, *, kh, kw, padding):
    """x_nhwc: (N,H,W,Cin) bf16; w_kk: (kh*kw,Cin,Cout_pad) bf16; bias_p: (1,Cout_pad) f32.
    Returns (N, Hout, Wout, Cout_pad) f32."""
    N, H, W, C = x_nhwc.shape
    Hp, Wp = H + 2 * padding, W + 2 * padding
    Hout, Wout = Hp - kh + 1, Wp - kw + 1
    cout_pad = w_kk.shape[-1]
    tn = _pick_tn(cout_pad, N)

    m_rows = _round_up(Hout * Wp, 8)          # flattened output rows per image
    max_off = (kh - 1) * Wp + (kw - 1)
    # Fold the flatten padding into the single spatial pad (no extra HBM pass).
    extra = m_rows + max_off - Hp * Wp
    extra_rows = -(-extra // Wp) if extra > 0 else 0
    xp = jnp.pad(x_nhwc, ((0, 0), (padding, padding + extra_rows),
                          (padding, padding), (0, 0)))
    l_flat = (Hp + extra_rows) * Wp
    xf = xp.reshape(N, l_flat, C)             # contiguous -> free reshape

    offsets = tuple(i * Wp + j for i in range(kh) for j in range(kw))
    kernel = functools.partial(_fused_conv_kernel, offsets=offsets, m_rows=m_rows)

    out = pl.pallas_call(
        kernel,
        out_shape=jax.ShapeDtypeStruct((N, m_rows, cout_pad), jnp.float32),
        grid_spec=pltpu.PrefetchScalarGridSpec(
            num_scalar_prefetch=0,
            grid=(N, cout_pad // tn),
            in_specs=[
                # Input slab stays resident across the output-channel axis.
                pl.BlockSpec((1, l_flat, C), lambda n, jc: (n, 0, 0)),
                pl.BlockSpec((kh * kw, C, tn), lambda n, jc: (0, 0, jc)),
                pl.BlockSpec((1, tn), lambda n, jc: (0, jc)),
            ],
            out_specs=pl.BlockSpec((1, m_rows, tn), lambda n, jc: (n, 0, jc)),
        ),
        compiler_params=pltpu.CompilerParams(
            dimension_semantics=("parallel", "parallel"),
            **_vmem_limit_kwargs(),
        ),
    )(xf, w_kk, bias_p)

    # Valid region: first Hout*Wp rows; first Wout columns of each Wp-wide group.
    out = out[:, :Hout * Wp, :].reshape(N, Hout, Wp, cout_pad)[:, :, :Wout, :]
    return out


# ---------------------------------------------------------------------------
# Fallback tiled matmul + bias kernel (used only for stride != 1).
# ---------------------------------------------------------------------------
def _matmul_bias_kernel(a_ref, b_ref, bias_ref, o_ref, acc_ref):
    k = pl.program_id(2)

    @pl.when(k == 0)
    def _():
        acc_ref[...] = jnp.zeros_like(acc_ref)

    acc_ref[...] += jnp.dot(a_ref[...], b_ref[...],
                            preferred_element_type=jnp.float32)

    @pl.when(k == pl.num_programs(2) - 1)
    def _():
        o_ref[...] = (acc_ref[...] + bias_ref[...]).astype(o_ref.dtype)


def pallas_matmul_bias(a, b, bias_p):
    """a: (M,K) bf16, b: (K,Np) bf16 (Np lane-padded), bias_p: (1,Np) f32 -> (M,Np) f32."""
    M, K = a.shape
    Np = b.shape[1]
    tm = 512 if M >= 512 else _round_up(M, 16)        # 16: bf16 sublane packing
    tk = _round_up(K, 128) if K <= 2048 else 512      # whole-K reduction when it fits
    tn = Np if Np <= 512 else next(c for c in (512, 384, 256, 128) if Np % c == 0)

    Mp, Kp = _round_up(M, tm), _round_up(K, tk)
    if (Mp, Kp) != (M, K):
        a = jnp.pad(a, ((0, Mp - M), (0, Kp - K)))
    if Kp != K:
        b = jnp.pad(b, ((0, Kp - K), (0, 0)))

    out = pl.pallas_call(
        _matmul_bias_kernel,
        out_shape=jax.ShapeDtypeStruct((Mp, Np), jnp.float32),
        grid_spec=pltpu.PrefetchScalarGridSpec(
            num_scalar_prefetch=0,
            grid=(Mp // tm, Np // tn, Kp // tk),
            in_specs=[
                pl.BlockSpec((tm, tk), lambda i, j, k: (i, k)),
                pl.BlockSpec((tk, tn), lambda i, j, k: (k, j)),
                pl.BlockSpec((1, tn), lambda i, j, k: (0, j)),
            ],
            out_specs=pl.BlockSpec((tm, tn), lambda i, j, k: (i, j)),
            scratch_shapes=[pltpu.VMEM((tm, tn), jnp.float32)],
        ),
        compiler_params=pltpu.CompilerParams(
            dimension_semantics=("parallel", "parallel", "arbitrary"),
            **_vmem_limit_kwargs(),
        ),
    )(a, b, bias_p)
    return out[:M]


# ---------------------------------------------------------------------------
# Module wrapper.
# ---------------------------------------------------------------------------
class DistributedConv2dPallas:
    """Pallas equivalent of DistributedConv2d: prune input channels, compute all
    partial convs (output-channel slices) in ONE fused conv, return NCHW."""

    def __init__(self, key, is_input_channel_unpruned, out_channel_splits,
                 kernel_size=3, stride=1, padding=1):
        self.is_input_channel_unpruned = list(is_input_channel_unpruned)
        self.kept_idx = jnp.array(
            [i for i, k in enumerate(self.is_input_channel_unpruned) if k],
            dtype=jnp.int32)
        cin_kept = int(self.kept_idx.shape[0])
        self.kh = self.kw = kernel_size
        self.stride = stride
        self.padding = padding
        self.out_channel_splits = list(out_channel_splits)

        # Deterministic synthetic parameters: each "worker" owns a slice of the
        # output channels of the original conv (weight: (Cout_i, Cin_kept, kh, kw)).
        self.weights, self.biases = [], []
        for cout in out_channel_splits:
            key, wk, bk = jax.random.split(key, 3)
            self.weights.append(0.1 * jax.random.normal(
                wk, (cout, cin_kept, self.kh, self.kw), dtype=jnp.float32))
            self.biases.append(0.1 * jax.random.normal(bk, (cout,), dtype=jnp.float32))

        # Fuse all worker weight slices once: concat along out-channels is exactly
        # equivalent to the per-worker conv + channel concat of the PyTorch module.
        w_full = jnp.concatenate(self.weights, axis=0)            # (Cout, Cin, kh, kw)
        self.cout_total = int(w_full.shape[0])
        self.cout_pad = _round_up(self.cout_total, 128)           # lane-dense output
        w_hwio = jnp.transpose(w_full, (2, 3, 1, 0))               # (kh, kw, Cin, Cout)
        w_hwio = jnp.pad(w_hwio, ((0, 0), (0, 0), (0, 0),
                                  (0, self.cout_pad - self.cout_total)))
        # Per-tap matrices for the fused (implicit-im2col) stride-1 kernel ...
        self.w_kk = w_hwio.reshape(self.kh * self.kw, cin_kept,
                                   self.cout_pad).astype(jnp.bfloat16)
        # ... and the same data flattened for the stride!=1 im2col fallback
        # (ordering (i, j, c) matches the NHWC lane-axis concat below).
        self.w_mat = self.w_kk.reshape(self.kh * self.kw * cin_kept, self.cout_pad)
        bias_full = jnp.concatenate(self.biases, axis=0)
        self.bias_p = jnp.pad(
            bias_full, (0, self.cout_pad - self.cout_total)
        ).reshape(1, self.cout_pad).astype(jnp.float32)

        self._fwd = jax.jit(self._forward)

    def _forward(self, x):
        # x: (N, C, H, W) f32, NCHW like PyTorch.
        x = x[:, self.kept_idx, :, :]                              # prune input channels
        # NCHW -> NHWC once (1x of the data), bf16 for the MXU.
        x = jnp.transpose(x, (0, 2, 3, 1)).astype(jnp.bfloat16)
        if self.stride == 1:
            out = conv2d_stride1_fused(x, self.w_kk, self.bias_p,
                                       kh=self.kh, kw=self.kw, padding=self.padding)
        else:
            out = self._conv_im2col(x)
        out = out[..., :self.cout_total]
        # Back to NCHW to match the PyTorch module's output convention.
        return jnp.transpose(out, (0, 3, 1, 2))

    def _conv_im2col(self, x_nhwc):
        # Fallback for stride != 1: NHWC-first im2col (only 1x of the data is
        # transposed; the kh*kw shifted views concat on the lane axis) feeding
        # the tiled matmul + bias kernel.
        N, H, W, C = x_nhwc.shape
        p, s, kh, kw = self.padding, self.stride, self.kh, self.kw
        xp = jnp.pad(x_nhwc, ((0, 0), (p, p), (p, p), (0, 0)))
        Hout = (H + 2 * p - kh) // s + 1
        Wout = (W + 2 * p - kw) // s + 1
        cols = [xp[:, i:i + s * Hout:s, j:j + s * Wout:s, :]
                for i in range(kh) for j in range(kw)]
        patches = jnp.concatenate(cols, axis=-1).reshape(N * Hout * Wout, kh * kw * C)
        out = pallas_matmul_bias(patches, self.w_mat, self.bias_p)
        return out.reshape(N, Hout, Wout, self.cout_pad)

    def __call__(self, x):
        return self._fwd(x)


if __name__ == "__main__":
    key = jax.random.PRNGKey(0)
    key, xk, mk = jax.random.split(key, 3)

    # Small shapes: batch=2, in_channels=4 (one pruned), spatial=16x16,
    # output channels split across 3 "workers" as [2, 4, 2].
    N, C, H, W = 2, 4, 16, 16
    is_input_channel_unpruned = [True, False, True, True]
    out_channel_splits = [2, 4, 2]

    x = jax.random.normal(xk, (N, C, H, W), dtype=jnp.float32)

    module = DistributedConv2dPallas(mk, is_input_channel_unpruned,
                                     out_channel_splits,
                                     kernel_size=3, stride=1, padding=1)
    y = jax.block_until_ready(module(x))

    # Correctness check against XLA's native conv on the same bf16-cast inputs,
    # accumulating in f32 — apples-to-apples with the MXU matmuls in the kernel.
    x_kept = x[:, module.kept_idx, :, :].astype(jnp.bfloat16)
    w_full = jnp.concatenate(module.weights, axis=0).astype(jnp.bfloat16)
    b_full = jnp.concatenate(module.biases, axis=0)
    ref = jax.lax.conv_general_dilated(
        x_kept, w_full, window_strides=(1, 1), padding=[(1, 1), (1, 1)],
        dimension_numbers=("NCHW", "OIHW", "NCHW"),
        preferred_element_type=jnp.float32,
    ) + b_full[None, :, None, None]

    assert y.shape == (N, sum(out_channel_splits), H, W)
    assert jnp.allclose(y, ref, atol=1e-2, rtol=1e-2)
    print("KERNEL_OK")
</pallas_src>

<mosaic_0001>
module attributes {stable_mosaic.version = 11 : i64} {
  func.func @_fused_conv_kernel(%arg0: i32, %arg1: i32, %arg2: memref<1x342x3xbf16, #tpu.memory_space<vmem>>, %arg3: memref<9x3x128xbf16, #tpu.memory_space<vmem>>, %arg4: memref<1x128xf32, #tpu.memory_space<vmem>>, %arg5: memref<1x288x128xf32, #tpu.memory_space<vmem>>) attributes {dimension_semantics = [#tpu.dimension_semantics<parallel>, #tpu.dimension_semantics<parallel>], iteration_bounds = array<i64: 2, 1>, scalar_prefetch = 0 : i64, scratch_operands = 0 : i64, tpu.core_type = #tpu.core_type<tc>, window_params = [{transform_indices = @transform_0, window_bounds = array<i64: 1, 342, 3>}, {transform_indices = @transform_1, window_bounds = array<i64: 9, 3, 128>}, {transform_indices = @transform_2, window_bounds = array<i64: 1, 128>}, {transform_indices = @transform_3, window_bounds = array<i64: 1, 288, 128>}]} {
    %cst = arith.constant 0.000000e+00 : f32
    %0 = vector.broadcast %cst : f32 to vector<288x128xf32>
    %c0 = arith.constant 0 : index
    %c0_0 = arith.constant 0 : index
    %c0_1 = arith.constant 0 : index
    %1 = vector.load %arg2[%c0, %c0_0, %c0_1] : memref<1x342x3xbf16, #tpu.memory_space<vmem>>, vector<1x288x3xbf16>
    %2 = vector.shape_cast %1 : vector<1x288x3xbf16> to vector<288x3xbf16>
    %c0_2 = arith.constant 0 : index
    %c0_3 = arith.constant 0 : index
    %c0_4 = arith.constant 0 : index
    %3 = vector.load %arg3[%c0_2, %c0_3, %c0_4] : memref<9x3x128xbf16, #tpu.memory_space<vmem>>, vector<1x3x128xbf16>
    %4 = vector.shape_cast %3 : vector<1x3x128xbf16> to vector<3x128xbf16>
    %cst_5 = arith.constant dense<0.000000e+00> : vector<288x128xf32>
    %5 = tpu.matmul %2, %4, %cst_5 {dimension_numbers = #tpu.dot_dimension_numbers<[1], [0], [0], [1], [0, 0, 1, 1], [], []>} : vector<288x3xbf16>, vector<3x128xbf16>, vector<288x128xf32> -> vector<288x128xf32>
    %6 = arith.addf %0, %5 : vector<288x128xf32>
    %c0_6 = arith.constant 0 : index
    %c1 = arith.constant 1 : index
    %c0_7 = arith.constant 0 : index
    %7 = vector.load %arg2[%c0_6, %c1, %c0_7] : memref<1x342x3xbf16, #tpu.memory_space<vmem>>, vector<1x288x3xbf16>
    %8 = vector.shape_cast %7 : vector<1x288x3xbf16> to vector<288x3xbf16>
    %c1_8 = arith.constant 1 : index
    %c0_9 = arith.constant 0 : index
    %c0_10 = arith.constant 0 : index
    %9 = vector.load %arg3[%c1_8, %c0_9, %c0_10] : memref<9x3x128xbf16, #tpu.memory_space<vmem>>, vector<1x3x128xbf16>
    %10 = vector.shape_cast %9 : vector<1x3x128xbf16> to vector<3x128xbf16>
    %cst_11 = arith.constant dense<0.000000e+00> : vector<288x128xf32>
    %11 = tpu.matmul %8, %10, %cst_11 {dimension_numbers = #tpu.dot_dimension_numbers<[1], [0], [0], [1], [0, 0, 1, 1], [], []>} : vector<288x3xbf16>, vector<3x128xbf16>, vector<288x128xf32> -> vector<288x128xf32>
    %12 = arith.addf %6, %11 : vector<288x128xf32>
    %c0_12 = arith.constant 0 : index
    %c2 = arith.constant 2 : index
    %c0_13 = arith.constant 0 : index
    %13 = vector.load %arg2[%c0_12, %c2, %c0_13] : memref<1x342x3xbf16, #tpu.memory_space<vmem>>, vector<1x288x3xbf16>
    %14 = vector.shape_cast %13 : vector<1x288x3xbf16> to vector<288x3xbf16>
    %c2_14 = arith.constant 2 : index
    %c0_15 = arith.constant 0 : index
    %c0_16 = arith.constant 0 : index
    %15 = vector.load %arg3[%c2_14, %c0_15, %c0_16] : memref<9x3x128xbf16, #tpu.memory_space<vmem>>, vector<1x3x128xbf16>
    %16 = vector.shape_cast %15 : vector<1x3x128xbf16> to vector<3x128xbf16>
    %cst_17 = arith.constant dense<0.000000e+00> : vector<288x128xf32>
    %17 = tpu.matmul %14, %16, %cst_17 {dimension_numbers = #tpu.dot_dimension_numbers<[1], [0], [0], [1], [0, 0, 1, 1], [], []>} : vector<288x3xbf16>, vector<3x128xbf16>, vector<288x128xf32> -> vector<288x128xf32>
    %18 = arith.addf %12, %17 : vector<288x128xf32>
    %c0_18 = arith.constant 0 : index
    %c18 = arith.constant 18 : index
    %c0_19 = arith.constant 0 : index
    %19 = vector.load %arg2[%c0_18, %c18, %c0_19] : memref<1x342x3xbf16, #tpu.memory_space<vmem>>, vector<1x288x3xbf16>
    %20 = vector.shape_cast %19 : vector<1x288x3xbf16> to vector<288x3xbf16>
    %c3 = arith.constant 3 : index
    %c0_20 = arith.constant 0 : index
    %c0_21 = arith.constant 0 : index
    %21 = vector.load %arg3[%c3, %c0_20, %c0_21] : memref<9x3x128xbf16, #tpu.memory_space<vmem>>, vector<1x3x128xbf16>
    %22 = vector.shape_cast %21 : vector<1x3x128xbf16> to vector<3x128xbf16>
    %cst_22 = arith.constant dense<0.000000e+00> : vector<288x128xf32>
    %23 = tpu.matmul %20, %22, %cst_22 {dimension_numbers = #tpu.dot_dimension_numbers<[1], [0], [0], [1], [0, 0, 1, 1], [], []>} : vector<288x3xbf16>, vector<3x128xbf16>, vector<288x128xf32> -> vector<288x128xf32>
    %24 = arith.addf %18, %23 : vector<288x128xf32>
    %c0_23 = arith.constant 0 : index
    %c19 = arith.constant 19 : index
    %c0_24 = arith.constant 0 : index
    %25 = vector.load %arg2[%c0_23, %c19, %c0_24] : memref<1x342x3xbf16, #tpu.memory_space<vmem>>, vector<1x288x3xbf16>
    %26 = vector.shape_cast %25 : vector<1x288x3xbf16> to vector<288x3xbf16>
    %c4 = arith.constant 4 : index
    %c0_25 = arith.constant 0 : index
    %c0_26 = arith.constant 0 : index
    %27 = vector.load %arg3[%c4, %c0_25, %c0_26] : memref<9x3x128xbf16, #tpu.memory_space<vmem>>, vector<1x3x128xbf16>
    %28 = vector.shape_cast %27 : vector<1x3x128xbf16> to vector<3x128xbf16>
    %cst_27 = arith.constant dense<0.000000e+00> : vector<288x128xf32>
    %29 = tpu.matmul %26, %28, %cst_27 {dimension_numbers = #tpu.dot_dimension_numbers<[1], [0], [0], [1], [0, 0, 1, 1], [], []>} : vector<288x3xbf16>, vector<3x128xbf16>, vector<288x128xf32> -> vector<288x128xf32>
    %30 = arith.addf %24, %29 : vector<288x128xf32>
    %c0_28 = arith.constant 0 : index
    %c20 = arith.constant 20 : index
    %c0_29 = arith.constant 0 : index
    %31 = vector.load %arg2[%c0_28, %c20, %c0_29] : memref<1x342x3xbf16, #tpu.memory_space<vmem>>, vector<1x288x3xbf16>
    %32 = vector.shape_cast %31 : vector<1x288x3xbf16> to vector<288x3xbf16>
    %c5 = arith.constant 5 : index
    %c0_30 = arith.constant 0 : index
    %c0_31 = arith.constant 0 : index
    %33 = vector.load %arg3[%c5, %c0_30, %c0_31] : memref<9x3x128xbf16, #tpu.memory_space<vmem>>, vector<1x3x128xbf16>
    %34 = vector.shape_cast %33 : vector<1x3x128xbf16> to vector<3x128xbf16>
    %cst_32 = arith.constant dense<0.000000e+00> : vector<288x128xf32>
    %35 = tpu.matmul %32, %34, %cst_32 {dimension_numbers = #tpu.dot_dimension_numbers<[1], [0], [0], [1], [0, 0, 1, 1], [], []>} : vector<288x3xbf16>, vector<3x128xbf16>, vector<288x128xf32> -> vector<288x128xf32>
    %36 = arith.addf %30, %35 : vector<288x128xf32>
    %c0_33 = arith.constant 0 : index
    %c36 = arith.constant 36 : index
    %c0_34 = arith.constant 0 : index
    %37 = vector.load %arg2[%c0_33, %c36, %c0_34] : memref<1x342x3xbf16, #tpu.memory_space<vmem>>, vector<1x288x3xbf16>
    %38 = vector.shape_cast %37 : vector<1x288x3xbf16> to vector<288x3xbf16>
    %c6 = arith.constant 6 : index
    %c0_35 = arith.constant 0 : index
    %c0_36 = arith.constant 0 : index
    %39 = vector.load %arg3[%c6, %c0_35, %c0_36] : memref<9x3x128xbf16, #tpu.memory_space<vmem>>, vector<1x3x128xbf16>
    %40 = vector.shape_cast %39 : vector<1x3x128xbf16> to vector<3x128xbf16>
    %cst_37 = arith.constant dense<0.000000e+00> : vector<288x128xf32>
    %41 = tpu.matmul %38, %40, %cst_37 {dimension_numbers = #tpu.dot_dimension_numbers<[1], [0], [0], [1], [0, 0, 1, 1], [], []>} : vector<288x3xbf16>, vector<3x128xbf16>, vector<288x128xf32> -> vector<288x128xf32>
    %42 = arith.addf %36, %41 : vector<288x128xf32>
    %c0_38 = arith.constant 0 : index
    %c37 = arith.constant 37 : index
    %c0_39 = arith.constant 0 : index
    %43 = vector.load %arg2[%c0_38, %c37, %c0_39] : memref<1x342x3xbf16, #tpu.memory_space<vmem>>, vector<1x288x3xbf16>
    %44 = vector.shape_cast %43 : vector<1x288x3xbf16> to vector<288x3xbf16>
    %c7 = arith.constant 7 : index
    %c0_40 = arith.constant 0 : index
    %c0_41 = arith.constant 0 : index
    %45 = vector.load %arg3[%c7, %c0_40, %c0_41] : memref<9x3x128xbf16, #tpu.memory_space<vmem>>, vector<1x3x128xbf16>
    %46 = vector.shape_cast %45 : vector<1x3x128xbf16> to vector<3x128xbf16>
    %cst_42 = arith.constant dense<0.000000e+00> : vector<288x128xf32>
    %47 = tpu.matmul %44, %46, %cst_42 {dimension_numbers = #tpu.dot_dimension_numbers<[1], [0], [0], [1], [0, 0, 1, 1], [], []>} : vector<288x3xbf16>, vector<3x128xbf16>, vector<288x128xf32> -> vector<288x128xf32>
    %48 = arith.addf %42, %47 : vector<288x128xf32>
    %c0_43 = arith.constant 0 : index
    %c38 = arith.constant 38 : index
    %c0_44 = arith.constant 0 : index
    %49 = vector.load %arg2[%c0_43, %c38, %c0_44] : memref<1x342x3xbf16, #tpu.memory_space<vmem>>, vector<1x288x3xbf16>
    %50 = vector.shape_cast %49 : vector<1x288x3xbf16> to vector<288x3xbf16>
    %c8 = arith.constant 8 : index
    %c0_45 = arith.constant 0 : index
    %c0_46 = arith.constant 0 : index
    %51 = vector.load %arg3[%c8, %c0_45, %c0_46] : memref<9x3x128xbf16, #tpu.memory_space<vmem>>, vector<1x3x128xbf16>
    %52 = vector.shape_cast %51 : vector<1x3x128xbf16> to vector<3x128xbf16>
    %cst_47 = arith.constant dense<0.000000e+00> : vector<288x128xf32>
    %53 = tpu.matmul %50, %52, %cst_47 {dimension_numbers = #tpu.dot_dimension_numbers<[1], [0], [0], [1], [0, 0, 1, 1], [], []>} : vector<288x3xbf16>, vector<3x128xbf16>, vector<288x128xf32> -> vector<288x128xf32>
    %54 = arith.addf %48, %53 : vector<288x128xf32>
    %c0_48 = arith.constant 0 : index
    %c0_49 = arith.constant 0 : index
    %55 = vector.load %arg4[%c0_48, %c0_49] : memref<1x128xf32, #tpu.memory_space<vmem>>, vector<1x128xf32>
    %56 = vector.broadcast %55 : vector<1x128xf32> to vector<288x128xf32>
    %57 = arith.addf %54, %56 : vector<288x128xf32>
    %c0_50 = arith.constant 0 : index
    %c0_51 = arith.constant 0 : index
    %c0_52 = arith.constant 0 : index
    %58 = vector.load %arg5[%c0_50, %c0_51, %c0_52] : memref<1x288x128xf32, #tpu.memory_space<vmem>>, vector<1x288x128xf32>
    %59 = vector.shape_cast %58 : vector<1x288x128xf32> to vector<288x128xf32>
    %60 = vector.shape_cast %57 : vector<288x128xf32> to vector<1x288x128xf32>
    tpu.vector_store %arg5[%c0_50, %c0_51, %c0_52], %60 {strides = array<i32>} : memref<1x288x128xf32, #tpu.memory_space<vmem>>, vector<1x288x128xf32>,
    return
  }
  func.func @transform_0(%arg0: i32, %arg1: i32) -> (i32, i32, i32) {
    %c0_i32 = arith.constant 0 : i32
    %c0_i32_0 = arith.constant 0 : i32
    %c0_i32_1 = arith.constant 0 : i32
    return %arg0, %c0_i32, %c0_i32_0 : i32, i32, i32
  }
  func.func @transform_1(%arg0: i32, %arg1: i32) -> (i32, i32, i32) {
    %c0_i32 = arith.constant 0 : i32
    %c0_i32_0 = arith.constant 0 : i32
    %c0_i32_1 = arith.constant 0 : i32
    return %c0_i32, %c0_i32_0, %arg1 : i32, i32, i32
  }
  func.func @transform_2(%arg0: i32, %arg1: i32) -> (i32, i32) {
    %c0_i32 = arith.constant 0 : i32
    %c0_i32_0 = arith.constant 0 : i32
    return %c0_i32, %arg1 : i32, i32
  }
  func.func @transform_3(%arg0: i32, %arg1: i32) -> (i32, i32, i32) {
    %c0_i32 = arith.constant 0 : i32
    %c0_i32_0 = arith.constant 0 : i32
    return %arg0, %c0_i32, %arg1 : i32, i32, i32
  }
}

</mosaic_0001>

<bundles_post_ra>
// kernel: _forward.1
= control target key start
LH: loop header
LB: loop body
LE: loop exit
PB: predicated region body
PF: predicated region fallthrough
CT: control target
= control target key end

     0   :  { %s4751_s12 = smov 0   ;;  %s4753_s13 = smov 0   ;;  %s6155_s0 = inlined_call_operand.vmem [shape: bf16[2,342,3], index: 0, kind: input, shape index: {}]   ;;  %s6156_s1 = inlined_call_operand.vmem [shape: bf16[9,3,128], index: 1, kind: input, shape index: {}]   ;;  %s6157_s2 = inlined_call_operand.vmem [shape: f32[1,128], index: 2, kind: input, shape index: {}]   ;;  %s6158_s3 = inlined_call_operand.vmem [shape: f32[2,288,128], index: 3, kind: output, shape index: {}]  }
   0x1   :  { %s4755_s14 = smov 0  }
   0x2 LB: > { %s25_s15 = sadd.s32 1, %s4724_s13  ;;  %p3864_p0 = scmp.ge.s32.totalorder %s4728_s14, 1  ;;  %s4728_s14 = sphi %s4755_s14, %s13_s14   ;;  %s4724_s13 = sphi %s4753_s13, %s6198_s13   ;;  %s4720_s12 = sphi %s4751_s12, %s6197_s12  }
   0x3   : > { %p27_p1 = scmp.ge.s32.totalorder %s25_s15, 2  ;;  %p168_p2 = scmp.lt.s32.totalorder %s4728_s14, 3 }
   0x5   : > { %s6200_s15 = smov (%p27_p1, %s25_s15), 0  ;;  %p169_p3 = pnand %p3864_p0, %p168_p2 }
   0x7   : > { %172 = sbr.rel (%p169_p3) target bundleno = 553 (0x229), region = 32 }
   0xc   : > { %v3867_v0 = vld [vmem:[%s6156_s1 + $0x2] sm:$0x3]  ;;  %vm560_vm0 = vcmask 1040384   ;;  %vm561_vm1 = vcmask 1041408   ;;  %p202_p4 = scmp.lt.s32.totalorder %s4720_s12, 1  ;;  %v4730_v1 = vmov 65535  }
   0xd   : > { %v562_v2 = vsel %vm560_vm0, 4294967295, %v4730_v1  ;;  %v3923_v3 = vld [vmem:[%s6156_s1 + $0x4] sm:$0x3]  ;;  %v259_v5 = vld [vmem:[%s6156_s1] sm:$0x3]  ;;  %vm505_vm3 = vcmask 23552  }
   0xe   : > { %v4775_v4 = vsel %vm561_vm1, %v562_v2, 0  ;;  %s6202_s12 = smov (!%p202_p4, %s4720_s12), 1  ;;  %vm356_vm2 = vsmask.f32 7424  ;;  %v3943_v13 = vld [vmem:[%s6156_s1 + $0x6] sm:$0x3] }
   0xf   : > { %v565_v6 = vand.u32 %v3867_v0, %v4775_v4  ;;  %v4784_v7 = vand.u32 %v3923_v3, %v4775_v4  ;;  %v4787_v8 = vand.u32 %v4775_v4, %v259_v5  ;;  %s4617_s22 = smul.u32 172, %s6202_s12  ;;  %v3981_v14 = vld [vmem:[%s6156_s1 + $0x8] sm:$0x3]  ;;  %v4835_v30 = vand.u32 %v3943_v13, %v4775_v4 }
  0x10   : > { %v4843_v35 = vand.u32 %v3981_v14, %v4775_v4  ;;  %vm966_vm4 = vcmask 1046528   ;;  %vm2166_vm5 = vcmask 1045504   ;;  %vm1719_vm6 = vsmask.f32 6400  ;;  %s4618_s11 = smul.u32 288, %s6202_s12 }
  0x11   : > { %4273 = vmatprep.subr.bf16.mxu0 %v565_v6  ;;  %4615 = vmatprep.subr.bf16.mxu1 %v565_v6  ;;  %s4793_s25 = scalar_lea.vmem %s6155_s0, %s4617_s22  ;;  %vm3366_vm7 = vcmask 1044480   ;;  %vm2919_vm8 = vsmask.f32 5376 }
  0x12   : > { %4274 = vmatpush3.bf16.msra.mxu0 %v565_v6  ;;  %4616 = vmatpush3.bf16.msra.mxu1 %v565_v6  ;;  %v223_v9 = vld [vmem:[%s4793_s25] sm:$0xf]  ;;  %v4797_v10 = vld [vmem:[%s4793_s25 + $0x4] sm:$0xf]  ;;  %v4805_v12 = vld [vmem:[%s4793_s25 + $0x8] sm:$0xff]   ;;  %s6038_s20 = scalar_lea.vmem %s6158_s3, %s4618_s11 }
  0x13   : > { %4349 = vmatprep.subr.bf16.mxu0 %v4784_v7  ;;  %4311 = vmatprep.subr.bf16.mxu1 %v4787_v8  ;;  %v4802_v11 = vcombine.low %v223_v9, %v4797_v10  ;;  %v365_v17 = vshll.u32 %v4805_v12, 16  ;;  %v369_v18 = vshrl.u32 %v4805_v12, 16  ;;  %v4818_v19 = vld [vmem:[%s4793_s25 + $0x50] sm:$0xff]   ;;  %v4821_v20 = vld [vmem:[%s4793_s25 + $0x58] sm:$0xff]   ;;  %v4832_v29 = vld [vmem:[%s4793_s25 + $0x60] sm:$0xff]  }
  0x14   : > { %v4824_v21 = vld [vmem:[%s4793_s25 + $0x10] sm:$0xff]   ;;  %v437_v24 = vshll.u32 %v4818_v19, 16  ;;  %v441_v25 = vshrl.u32 %v4818_v19, 16  ;;  %v445_v26 = vshll.u32 %v4821_v20, 16  ;;  %v449_v27 = vshrl.u32 %v4821_v20, 16  ;;  %v4840_v34 = vld [vmem:[%s4793_s25 + $0x18] sm:$0xff]  }
  0x15   : > { %v358_v15 = vshrl.u32 %v4802_v11, 16  ;;  %v360_v16 = vshll.u32 %v4802_v11, 16  ;;  %v367_v23 = vrot.slane %v365_v17, 1  ;;  %v373_v28 = vshll.u32 %v4824_v21, 16  ;;  %v4851_v43 = vld [vmem:[%s4793_s25 + $0x68] sm:$0xff]   ;;  %v4855_v45 = vld [vmem:[%s4793_s25 + $0x20] sm:$0xff]  }
  0x16   : > { %v4837_v33 = vrot.slane %v437_v24, 1  ;;  %v447_v36 = vrot.slane %v445_v26, 1  ;;  %v453_v38 = vshll.u32 %v4832_v29, 16  ;;  %v377_v39 = vshrl.u32 %v4824_v21, 16  ;;  %v4860_v50 = vld [vmem:[%s4793_s25 + $0x70] sm:$0xff]   ;;  %v4867_v55 = vld [vmem:[%s4793_s25 + $0x28] sm:$0xff]  }
  0x17   : > { %v362_v22 = vrot.slane %v360_v16, 1  ;;  %v371_v32 = vor.u32 %v369_v18, %v367_v23  ;;  %v375_v37 = vrot.slane %v373_v28, 1  ;;  %v381_v42 = vshll.u32 %v4840_v34, 16  ;;  %v4883_v3 = vld [vmem:[%s4793_s25 + $0x78] sm:$0xff]   ;;  %v4892_v16 = vld [vmem:[%s4793_s25 + $0x30] sm:$0xff]   ;;  %v4895_v17 = vld [vmem:[%s4793_s25 + $0x80] sm:$0xff]  }
  0x18   : > { %v443_v41 = vor.u32 %v441_v25, %v4837_v33  ;;  %v457_v44 = vshrl.u32 %v4832_v29, 16  ;;  %v451_v46 = vor.u32 %v449_v27, %v447_v36  ;;  %v455_v48 = vrot.slane %v453_v38, 1 }
  0x19   : > { %v363_v31 = vor.u32 %v362_v22, %v358_v15  ;;  %v376_v47 = vsel %vm356_vm2, %v371_v32, %v375_v37  ;;  %v379_v49 = vor.u32 %v377_v39, %v375_v37  ;;  %v383_v52 = vrot.slane %v381_v42, 1 }
  0x1a   : > { %v448_v51 = vsel %vm356_vm2, %v443_v41, %v447_v36  ;;  %v461_v53 = vshll.u32 %v4851_v43, 16  ;;  %v385_v54 = vshrl.u32 %v4840_v34, 16  ;;  %v456_v56 = vsel %vm356_vm2, %v451_v46, %v455_v48  ;;  %v4909_v36 = vld [vmem:[%s4793_s25 + $0x88] sm:$0xff]   ;;  %v4918_v46 = vld [vmem:[%s4793_s25 + $0x40] sm:$0xff]  }
  0x1b   : > { %v368_v40 = vsel %vm356_vm2, %v363_v31, %v367_v23  ;;  %4295 = vmatprep.mubr.msk.bf16.mxu1 %vm505_vm3, %v448_v51  ;;  %v459_v57 = vor.u32 %v457_v44, %v455_v48  ;;  %v389_v58 = vshll.u32 %v4855_v45, 16  ;;  %v465_v59 = vshrl.u32 %v4851_v43, 16  ;;  %v4904_v31 = vld [vmem:[%s4793_s25 + $0x38] sm:$0xff]   ;;  %v4661_v51 = vld [vmem:[%s4793_s25 + $0x90] ss:$0 sps:$4 sm:$0x11]  }
  0x1c   : > { %4275 = vmatprep.mubr.msk.bf16.mxu0 %vm505_vm3, %v368_v40  ;;  %4296 = vmatmul.mubr.msk.bf16.vlgmr.msra.gmra.mxu1 %vm505_vm3, %v456_v56  ;;  %v384_v60 = vsel %vm356_vm2, %v379_v49, %v383_v52  ;;  %v463_v61 = vrot.slane %v461_v53, 1  ;;  %v387_v62 = vor.u32 %v385_v54, %v383_v52  ;;  %v469_v63 = vshll.u32 %v4860_v50, 16 }
  0x1d   : > { %4276 = vmatmul.mubr.msk.bf16.vlgmr.msra.gmra.mxu0 %vm505_vm3, %v376_v47  ;;  %4312 = vmatpush3.bf16.msra.mxu1 %v4787_v8  ;;  %v391_v0 = vrot.slane %v389_v58, 1  ;;  %v393_v1 = vshrl.u32 %v4855_v45, 16  ;;  %v397_v2 = vshll.u32 %v4867_v55, 16  ;;  %v473_v9 = vshrl.u32 %v4860_v50, 16  ;;  %v4921_v47 = vld [vmem:[%s4793_s25 + $0x48] sm:$0xff]  }
  0x1e   : > { %4350 = vmatpush3.bf16.msra.mxu0 %v4784_v7  ;;  %4279 = vmatprep.mubr.msk.bf16.mxu0 %vm505_vm3, %v384_v60  ;;  %v464_v5 = vsel %vm356_vm2, %v459_v57, %v463_v61  ;;  %v467_v6 = vor.u32 %v465_v59, %v463_v61  ;;  %v471_v7 = vrot.slane %v469_v63, 1  ;;  %v477_v15 = vshll.u32 %v4883_v3, 16 }
  0x1f   : > { %4425 = vmatprep.subr.bf16.mxu0 %v4843_v35  ;;  %4387 = vmatprep.subr.bf16.mxu1 %v4835_v30  ;;  %v392_v8 = vsel %vm356_vm2, %v387_v62, %v391_v0  ;;  %v395_v13 = vor.u32 %v393_v1, %v391_v0  ;;  %v399_v14 = vrot.slane %v397_v2, 1  ;;  %v401_v23 = vshrl.u32 %v4867_v55, 16 }
  0x20   : > { %4299 = vmatprep.mubr.msk.bf16.mxu1 %vm505_vm3, %v464_v5  ;;  %v472_v18 = vsel %vm356_vm2, %v467_v6, %v471_v7  ;;  %v475_v22 = vor.u32 %v473_v9, %v471_v7  ;;  %v481_v24 = vshrl.u32 %v4883_v3, 16  ;;  %v479_v26 = vrot.slane %v477_v15, 1  ;;  %v960_v6 = vld [vmem:[%s4793_s25] sm:$0xe] }
  0x21   : > { %v400_v25 = vsel %vm356_vm2, %v395_v13, %v399_v14  ;;  %v405_v27 = vshll.u32 %v4892_v16, 16  ;;  %v485_v28 = vshll.u32 %v4895_v17, 16  ;;  %v409_v32 = vshrl.u32 %v4892_v16, 16 }
  0x22   : > { %v480_v37 = vsel %vm356_vm2, %v475_v22, %v479_v26  ;;  %v403_v38 = vor.u32 %v401_v23, %v399_v14  ;;  %v413_v41 = vshll.u32 %v4904_v31, 16  ;;  %v489_v42 = vshrl.u32 %v4895_v17, 16 }
  0x23   : > { %v407_v39 = vrot.slane %v405_v27, 1  ;;  %v487_v40 = vrot.slane %v485_v28, 1  ;;  %v493_v44 = vshll.u32 %v4909_v36, 16  ;;  %v483_v48 = vor.u32 %v481_v24, %v479_v26 }
  0x24   : > { %4300 = vmatmul.mubr.msk.bf16.gmra.mxu1 %vm505_vm3, %v472_v18  ;;  %v415_v52 = vrot.slane %v413_v41, 1  ;;  %v421_v56 = vshll.u32 %v4918_v46, 16  ;;  %v417_v58 = vshrl.u32 %v4904_v31, 16  ;;  %v425_v60 = vshrl.u32 %v4918_v46, 16 }
  0x25   : > { %4280 = vmatmul.mubr.msk.bf16.gmra.mxu0 %vm505_vm3, %v392_v8  ;;  %4303 = vmatprep.mubr.msk.bf16.mxu1 %vm505_vm3, %v480_v37  ;;  %v411_v49 = vor.u32 %v409_v32, %v407_v39  ;;  %v491_v53 = vor.u32 %v489_v42, %v487_v40  ;;  %v495_v54 = vrot.slane %v493_v44, 1  ;;  %v408_v57 = vsel %vm356_vm2, %v403_v38, %v407_v39  ;;  %v4001_v37 = vld [vmem:[%s6156_s1 + $0xa] sm:$0x3] }
  0x26   : > { %4283 = vmatprep.mubr.msk.bf16.mxu0 %vm505_vm3, %v400_v25  ;;  %v429_v61 = vshll.u32 %v4921_v47, 16  ;;  %v488_v62 = vsel %vm356_vm2, %v483_v48, %v487_v40  ;;  %v497_v63 = vshrl.u32 %v4909_v36, 16  ;;  %v501_v0 = vshll.u32 %v4661_v51, 16  ;;  %v4021_v40 = vld [vmem:[%s6156_s1 + $0xc] sm:$0x3] }
  0x27   : > { %v416_v59 = vsel %vm356_vm2, %v411_v49, %v415_v52  ;;  %v496_v1 = vsel %vm356_vm2, %v491_v53, %v495_v54  ;;  %v423_v2 = vrot.slane %v421_v56, 1  ;;  %v419_v5 = vor.u32 %v417_v58, %v415_v52  ;;  %v2160_v52 = vld [vmem:[%s4793_s25 + $0x8] sm:$0xc]  ;;  %v5018_v53 = vld [vmem:[%s4793_s25 + $0x10] sm:$0xff]   ;;  %v5027_v58 = vld [vmem:[%s4793_s25 + $0x20] sm:$0xff]  }
  0x28   : > { %v431_v9 = vrot.slane %v429_v61, 1  ;;  %v499_v8 = vor.u32 %v497_v63, %v495_v54  ;;  %v503_v13 = vrot.slane %v501_v0, 1  ;;  %v433_v15 = vshrl.u32 %v4921_v47, 16  ;;  %v5033_v61 = vld [vmem:[%s4793_s25 + $0x28] sm:$0xff]  }
  0x29   : > { %v427_v7 = vor.u32 %v425_v60, %v423_v2  ;;  %v424_v14 = vsel %vm356_vm2, %v419_v5, %v423_v2  ;;  %v3924_v22 = vcombine.low %v960_v6, %v4797_v10  ;;  %v1000_v24 = vrot.slane %v4909_v36, 1  ;;  %v5051_v6 = vld [vmem:[%s4793_s25 + $0x38] sm:$0xff]  }
  0x2a   : > { %v504_v23 = vsel %vm356_vm2, %v499_v8, %v503_v13  ;;  %v435_v25 = vor.u32 %v433_v15, %v431_v9  ;;  %v1002_v26 = vrot.slane %v4661_v51, 1  ;;  %v968_v28 = vrot.slane %v4805_v12, 1  ;;  %v5061_v13 = vld [vmem:[%s4793_s25 + $0x40] sm:$0xff]   ;;  %v5066_v15 = vld [vmem:[%s4793_s25 + $0x48] sm:$0xff]  }
  0x2b   : > { %v432_v18 = vsel %vm356_vm2, %v427_v7, %v431_v9  ;;  %v967_v27 = vrot.slane %v3924_v22, 1  ;;  %v4964_v39 = vand.u32 %v4001_v37, %v4775_v4  ;;  %v4981_v44 = vand.u32 %v4021_v40, %v4775_v4 }
  0x2c   : > { %4304 = vmatmul.mubr.msk.bf16.gmra.mxu1 %vm505_vm3, %v488_v62  ;;  %v4954_v10 = vsel %vm966_vm4, %v1000_v24, %v1002_v26  ;;  %v440_v32 = vsel %vm356_vm2, %v435_v25, %v4837_v33  ;;  %v972_v33 = vrot.slane %v4840_v34, 1  ;;  %v982_v51 = vrot.slane %v4918_v46, 1 }
  0x2d   : > { %4284 = vmatmul.mubr.msk.bf16.gmra.mxu0 %vm505_vm3, %v408_v57  ;;  %4307 = vmatprep.mubr.msk.bf16.mxu1 %vm505_vm3, %v496_v1  ;;  %v969_v38 = vsel %vm966_vm4, %v967_v27, %v968_v28  ;;  %v5023_v57 = vld [vmem:[%s4793_s25 + $0x18] sm:$0xff]   ;;  %v2172_v63 = vrot.slane %v5027_v58, 2  ;;  %v986_v0 = vrot.slane %v4818_v19, 1  ;;  %v5042_v1 = vld [vmem:[%s4793_s25 + $0x30] sm:$0xff]   ;;  %v988_v5 = vrot.slane %v4821_v20, 1 }
  0x2e   : > { %4287 = vmatprep.mubr.msk.bf16.mxu0 %vm505_vm3, %v416_v59  ;;  %v2170_v60 = vrot.slane %v5023_v57, 2  ;;  %v2174_v9 = vrot.slane %v5033_v61, 2  ;;  %v2176_v8 = vrot.slane %v5042_v1, 2  ;;  %v2180_v25 = vrot.slane %v5061_v13, 2 }
  0x2f   : > { %v2182_v26 = vrot.slane %v5066_v15, 2  ;;  %v990_v27 = vrot.slane %v4832_v29, 1  ;;  %v992_v37 = vrot.slane %v4851_v43, 1 }
  0x30   : > { %v5054_v7 = vsel %vm2166_vm5, %v2170_v60, %v2172_v63  ;;  %v5072_v22 = vsel %vm2166_vm5, %v2174_v9, %v2176_v8 }
  0x31   : > { %v993_v40 = vsel %vm966_vm4, %v990_v27, %v992_v37 }
  0x34   : > { %4308 = vmatmul.mubr.msk.bf16.gmra.mxu1 %vm505_vm3, %v504_v23 }
  0x35   : > { %4288 = vmatmul.mubr.msk.bf16.gmra.mxu0 %vm505_vm3, %v424_v14  ;;  %4313 = vmatprep.mubr.msk.bf16.mxu1 %vm505_vm3, %v4802_v11  ;;  %v970_v11 = vrot.slane %v4824_v21, 1  ;;  %v2178_v14 = vrot.slane %v5051_v6, 2 }
  0x36   : > { %4291 = vmatprep.mubr.msk.bf16.mxu0 %vm505_vm3, %v432_v18  ;;  %v5069_v18 = vsel %vm2166_vm5, %v2172_v63, %v2174_v9 }
  0x37   : > { %v971_v41 = vsel %vm966_vm4, %v968_v28, %v970_v11  ;;  %v973_v42 = vsel %vm966_vm4, %v970_v11, %v972_v33  ;;  %v5076_v23 = vsel %vm2166_vm5, %v2176_v8, %v2178_v14  ;;  %v5084_v28 = vsel %vm2166_vm5, %v2178_v14, %v2180_v25 }
  0x38   : > { %v991_v11 = vsel %vm966_vm4, %v988_v5, %v990_v27 }
  0x3c   : > { %4314 = vmatmul.mubr.msk.bf16.vlgmr.msra.gmra.mxu1 %vm505_vm3, %v4805_v12  ;;  %v974_v12 = vrot.slane %v4855_v45, 1 }
  0x3d   : > { %4292 = vmatmul.mubr.msk.bf16.gmra.mxu0 %vm505_vm3, %v440_v32  ;;  %4388 = vmatpush3.bf16.msra.mxu1 %v4835_v30  ;;  %v5087_v32 = vsel %vm2166_vm5, %v2180_v25, %v2182_v26  ;;  %v1741_v25 = vshll.u32 %v5023_v57, 16 }
  0x3e   : > { %4351 = vmatprep.mubr.msk.bf16.mxu0 %vm505_vm3, %v969_v38  ;;  %4317 = vmatprep.mubr.msk.bf16.mxu1 %vm505_vm3, %v4824_v21  ;;  %v976_v21 = vrot.slane %v4867_v55, 1  ;;  %v975_v30 = vsel %vm966_vm4, %v972_v33, %v974_v12  ;;  %v5095_v38 = vld [vmem:[%s4793_s25 + $0x50] sm:$0xff]   ;;  %v5099_v33 = vld [vmem:[%s4793_s25 + $0x58] sm:$0xff]  }
  0x3f   : > { %4463 = vmatprep.subr.bf16.mxu1 %v4964_v39 }
  0x40   : > { %v977_v48 = vsel %vm966_vm4, %v974_v12, %v976_v21 }
  0x44   : > { %4318 = vmatmul.mubr.msk.bf16.gmra.mxu1 %vm505_vm3, %v4840_v34  ;;  %v978_v34 = vrot.slane %v4892_v16, 1 }
  0x45   : > { %4352 = vmatmul.mubr.msk.bf16.vlgmr.msra.gmra.mxu0 %vm505_vm3, %v971_v41  ;;  %4321 = vmatprep.mubr.msk.bf16.mxu1 %vm505_vm3, %v4855_v45  ;;  %v2184_v41 = vrot.slane %v5095_v38, 2 }
  0x46   : > { %4426 = vmatpush3.bf16.msra.mxu0 %v4843_v35  ;;  %4355 = vmatprep.mubr.msk.bf16.mxu0 %vm505_vm3, %v973_v42  ;;  %v980_v35 = vrot.slane %v4904_v31, 1  ;;  %v979_v45 = vsel %vm966_vm4, %v976_v21, %v978_v34  ;;  %v996_v21 = vrot.slane %v4883_v3, 1 }
  0x47   : > { %4501 = vmatprep.subr.bf16.mxu0 %v4981_v44  ;;  %v5106_v42 = vsel %vm2166_vm5, %v2182_v26, %v2184_v41 }
  0x48   : > { %v981_v49 = vsel %vm966_vm4, %v978_v34, %v980_v35  ;;  %v983_v56 = vsel %vm966_vm4, %v980_v35, %v982_v51  ;;  %v5124_v35 = vld [vmem:[%s4793_s25 + $0x68] sm:$0xff]  }
  0x4c   : > { %4322 = vmatmul.mubr.msk.bf16.gmra.mxu1 %vm505_vm3, %v4867_v55  ;;  %v984_v55 = vrot.slane %v4921_v47, 1 }
  0x4d   : > { %4356 = vmatmul.mubr.msk.bf16.gmra.mxu0 %vm505_vm3, %v975_v30  ;;  %4325 = vmatprep.mubr.msk.bf16.mxu1 %vm505_vm3, %v4892_v16  ;;  %v5015_v16 = vld [vmem:[%s4793_s25 + $0xc] sm:$0xf]  ;;  %v1274_v30 = vld [vmem:[%s4793_s25 + $0x8] sm:$0xe] }
  0x4e   : > { %4359 = vmatprep.mubr.msk.bf16.mxu0 %vm505_vm3, %v977_v48  ;;  %v4002_v54 = vcombine.low %v2160_v52, %v5015_v16  ;;  %v5120_v48 = vld [vmem:[%s4793_s25 + $0x60] sm:$0xff]   ;;  %v998_v52 = vrot.slane %v4895_v17, 1 }
  0x50   : > { %v2167_v59 = vrot.slane %v4002_v54, 2  ;;  %v999_v63 = vsel %vm966_vm4, %v996_v21, %v998_v52 }
  0x54   : > { %4326 = vmatmul.mubr.msk.bf16.gmra.mxu1 %vm505_vm3, %v4904_v31  ;;  %v985_v31 = vsel %vm966_vm4, %v982_v51, %v984_v55  ;;  %v3944_v51 = vcombine.low %v1274_v30, %v5015_v16  ;;  %v1743_v30 = vrot.slane %v1741_v25, 2 }
  0x55   : > { %4360 = vmatmul.mubr.msk.bf16.gmra.mxu0 %vm505_vm3, %v979_v45  ;;  %4329 = vmatprep.mubr.msk.bf16.mxu1 %vm505_vm3, %v4918_v46  ;;  %v2168_v46 = vrot.slane %v5018_v53, 2 }
  0x56   : > { %4363 = vmatprep.mubr.msk.bf16.mxu0 %vm505_vm3, %v981_v49  ;;  %v2188_v49 = vrot.slane %v5120_v48, 2  ;;  %v1724_v16 = vshll.u32 %v3944_v51, 16 }
  0x57   : > { %v5036_v62 = vsel %vm2166_vm5, %v2167_v59, %v2168_v46  ;;  %v5045_v2 = vsel %vm2166_vm5, %v2168_v46, %v2170_v60  ;;  %v1406_v59 = vrot.slane %v3944_v51, 1  ;;  %v1407_v46 = vrot.slane %v5018_v53, 1  ;;  %v5147_v60 = vld [vmem:[%s4793_s25 + $0x70] sm:$0xff]  }
  0x58   : > { %v1726_v9 = vrot.slane %v1724_v16, 2 }
  0x5c   : > { %4330 = vmatmul.mubr.msk.bf16.gmra.mxu1 %vm505_vm3, %v4921_v47  ;;  %v987_v47 = vsel %vm966_vm4, %v984_v55, %v986_v0  ;;  %v1721_v55 = vshrl.u32 %v3944_v51, 16 }
  0x5d   : > { %4364 = vmatmul.mubr.msk.bf16.gmra.mxu0 %vm505_vm3, %v983_v56  ;;  %4333 = vmatprep.mubr.msk.bf16.mxu1 %vm505_vm3, %v4818_v19  ;;  %v989_v19 = vsel %vm966_vm4, %v986_v0, %v988_v5  ;;  %v1729_v56 = vshrl.u32 %v5018_v53, 16  ;;  %v1001_v0 = vsel %vm966_vm4, %v998_v52, %v1000_v24  ;;  %v5154_v5 = vld [vmem:[%s4793_s25 + $0x78] sm:$0xff]   ;;  %v1738_v24 = vshrl.u32 %v5023_v57, 16 }
  0x5e   : > { %4367 = vmatprep.mubr.msk.bf16.mxu0 %vm505_vm3, %v985_v31  ;;  %v1732_v31 = vshll.u32 %v5018_v53, 16  ;;  %v1408_v53 = vsel %vm966_vm4, %v1406_v59, %v1407_v46  ;;  %v1759_v59 = vshll.u32 %v5033_v61, 16 }
  0x5f   : > { %v1731_v8 = vrot.slane %v1729_v56, 1 }
  0x60   : > { %v1734_v14 = vrot.slane %v1732_v31, 2 }
  0x64   : > { %4334 = vmatmul.mubr.msk.bf16.gmra.mxu1 %vm505_vm3, %v4821_v20  ;;  %v2186_v20 = vrot.slane %v5099_v33, 2 }
  0x65   : > { %4368 = vmatmul.mubr.msk.bf16.gmra.mxu0 %vm505_vm3, %v987_v47  ;;  %4337 = vmatprep.mubr.msk.bf16.mxu1 %vm505_vm3, %v4832_v29  ;;  %v994_v29 = vrot.slane %v4860_v50, 1  ;;  %v2192_v47 = vrot.slane %v5147_v60, 2 }
  0x66   : > { %4371 = vmatprep.mubr.msk.bf16.mxu0 %vm505_vm3, %v989_v19  ;;  %v5111_v12 = vsel %vm2166_vm5, %v2184_v41, %v2186_v20  ;;  %v1409_v41 = vrot.slane %v5023_v57, 1 }
  0x67   : > { %v995_v34 = vsel %vm966_vm4, %v992_v37, %v994_v29  ;;  %v997_v45 = vsel %vm966_vm4, %v994_v29, %v996_v21  ;;  %v1735_v37 = vor.u32 %v1734_v14, %v1731_v8  ;;  %v5177_v29 = vld [vmem:[%s4793_s25 + $0x80] sm:$0xff]   ;;  %v1740_v21 = vrot.slane %v1738_v24, 1  ;;  %v5215_v14 = vld [vmem:[%s4793_s25 + $0x90] sm:$0xff]  }
  0x68   : > { %v1410_v57 = vsel %vm966_vm4, %v1407_v46, %v1409_v41  ;;  %v1765_v46 = vshrl.u32 %v5042_v1, 16  ;;  %v1415_v8 = vrot.slane %v5042_v1, 1 }
  0x69   : > { %v1744_v31 = vor.u32 %v1743_v30, %v1740_v21  ;;  %v1777_v30 = vshll.u32 %v5051_v6, 16 }
  0x6a   : > { %v1767_v24 = vrot.slane %v1765_v46, 1 }
  0x6c   : > { %4338 = vmatmul.mubr.msk.bf16.gmra.mxu1 %vm505_vm3, %v4851_v43  ;;  %v2190_v43 = vrot.slane %v5124_v35, 2 }
  0x6d   : > { %4372 = vmatmul.mubr.msk.bf16.gmra.mxu0 %vm505_vm3, %v991_v11  ;;  %4341 = vmatprep.mubr.msk.bf16.mxu1 %vm505_vm3, %v4860_v50  ;;  %v5132_v50 = vsel %vm2166_vm5, %v2186_v20, %v2188_v49  ;;  %v1747_v11 = vshrl.u32 %v5027_v58, 16  ;;  %v1411_v20 = vrot.slane %v5027_v58, 1 }
  0x6e   : > { %4375 = vmatprep.mubr.msk.bf16.mxu0 %vm505_vm3, %v993_v40  ;;  %v5137_v54 = vsel %vm2166_vm5, %v2188_v49, %v2190_v43  ;;  %v5161_v19 = vsel %vm2166_vm5, %v2190_v43, %v2192_v47  ;;  %v1750_v40 = vshll.u32 %v5027_v58, 16  ;;  %v2196_v43 = vrot.slane %v5177_v29, 2 }
  0x6f   : > { %v1749_v49 = vrot.slane %v1747_v11, 1  ;;  %v1412_v52 = vsel %vm966_vm4, %v1409_v41, %v1411_v20  ;;  %v2200_v11 = vrot.slane %v5215_v14, 2 }
  0x70   : > { %v1752_v51 = vrot.slane %v1750_v40, 2 }
  0x74   : > { %4342 = vmatmul.mubr.msk.bf16.gmra.mxu1 %vm505_vm3, %v4883_v3  ;;  %v1723_v3 = vrot.slane %v1721_v55, 1  ;;  %v1756_v55 = vshrl.u32 %v5033_v61, 16 }
  0x75   : > { %4376 = vmatmul.mubr.msk.bf16.gmra.mxu0 %vm505_vm3, %v995_v34  ;;  %4345 = vmatprep.mubr.msk.bf16.mxu1 %vm505_vm3, %v4895_v17  ;;  %v2194_v17 = vrot.slane %v5154_v5, 2  ;;  %v5180_v34 = vld [vmem:[%s4793_s25 + $0x88] sm:$0xff]  }
  0x76   : > { %4379 = vmatprep.mubr.msk.bf16.mxu0 %vm505_vm3, %v997_v45  ;;  %v1727_v27 = vor.u32 %v1726_v9, %v1723_v3  ;;  %v2198_v58 = vrot.slane %v5180_v34, 2  ;;  %v1413_v3 = vrot.slane %v5033_v61, 1  ;;  %v4079_v9 = vld [vmem:[%s6156_s1 + $0x10] sm:$0x3] }
  0x77   : > { %v5167_v26 = vsel %vm2166_vm5, %v2192_v47, %v2194_v17  ;;  %v5197_v56 = vsel %vm2166_vm5, %v2194_v17, %v2196_v43  ;;  %v1745_v47 = vsel %vm1719_vm6, %v1735_v37, %v1744_v31  ;;  %v1758_v17 = vrot.slane %v1756_v55, 1 }
  0x78   : > { %v1736_v45 = vsel %vm1719_vm6, %v1727_v27, %v1735_v37  ;;  %v5224_v27 = vand.u32 %v4079_v9, %v4775_v4  ;;  %v1416_v37 = vsel %vm966_vm4, %v1413_v3, %v1415_v8  ;;  %v5232_v41 = vsel %vm2166_vm5, %v2198_v58, %v2200_v11 }
  0x79   : > { %v1804_v9 = vshll.u32 %v5095_v38, 16 }
  0x7c   : > { %4346 = vmatmul.mubr.msk.bf16.gmra.mxu1 %vm505_vm3, %v4909_v36  ;;  %v4059_v36 = vld [vmem:[%s6156_s1 + $0xe] sm:$0x3] }
  0x7d   : > { %4380 = vmatmul.mubr.msk.bf16.gmra.mxu0 %vm505_vm3, %v999_v63  ;;  %4389 = vmatprep.mubr.msk.bf16.mxu1 %vm505_vm3, %v1408_v53  ;;  %v5194_v16 = vand.u32 %v4059_v36, %v4775_v4  ;;  %v1753_v63 = vor.u32 %v1752_v51, %v1749_v49  ;;  %v1761_v53 = vrot.slane %v1759_v59, 2  ;;  %v1774_v4 = vshrl.u32 %v5051_v6, 16 }
  0x7e   : > { %4383 = vmatprep.mubr.msk.bf16.mxu0 %vm505_vm3, %v1001_v0  ;;  %v1768_v0 = vshll.u32 %v5042_v1, 16  ;;  %v1414_v1 = vsel %vm966_vm4, %v1411_v20, %v1413_v3  ;;  %v1786_v49 = vshll.u32 %v5061_v13, 16  ;;  %v1419_v51 = vrot.slane %v5061_v13, 1 }
  0x7f   : > { %v1754_v25 = vsel %vm1719_vm6, %v1744_v31, %v1753_v63  ;;  %v1762_v21 = vor.u32 %v1761_v53, %v1758_v17  ;;  %v1801_v3 = vshrl.u32 %v5095_v38, 16  ;;  %v5263_v17 = vld [vmem:[%s4793_s25 + $0x14] sm:$0xf]  ;;  %v3360_v53 = vld [vmem:[%s4793_s25 + $0x10] sm:$0x8] }
  0x80   : > { %v1770_v61 = vrot.slane %v1768_v0, 2  ;;  %v1788_v31 = vrot.slane %v1786_v49, 2 }
  0x82   : > { %v1771_v36 = vor.u32 %v1770_v61, %v1767_v24 }
  0x84   : > { %4390 = vmatmul.mubr.msk.bf16.vlgmr.msra.gmra.mxu1 %vm505_vm3, %v1410_v57  ;;  %v1776_v57 = vrot.slane %v1774_v4, 1  ;;  %v5273_v4 = vld [vmem:[%s4793_s25 + $0x20] sm:$0xff]  }
  0x85   : > { %4384 = vmatmul.mubr.msk.bf16.gmra.mxu0 %vm505_vm3, %v4954_v10  ;;  %v5203_v10 = vsel %vm2166_vm5, %v2196_v43, %v2198_v58  ;;  %4464 = vmatpush3.bf16.msra.mxu1 %v4964_v39  ;;  %v5220_v39 = vld [vmem:[%s4793_s25 + $0x98] ss:$0 sps:$4 sm:$0x33]   ;;  %v1763_v43 = vsel %vm1719_vm6, %v1753_v63, %v1762_v21  ;;  %v1779_v58 = vrot.slane %v1777_v30, 2  ;;  %v1795_v63 = vshll.u32 %v5066_v15, 16 }
  0x86   : > { %4427 = vmatprep.mubr.msk.bf16.mxu0 %vm505_vm3, %v1736_v45  ;;  %4393 = vmatprep.mubr.msk.bf16.mxu1 %vm505_vm3, %v1412_v52  ;;  %v2202_v40 = vrot.slane %v5220_v39, 2  ;;  %v1783_v45 = vshrl.u32 %v5061_v13, 16  ;;  %v1772_v52 = vsel %vm1719_vm6, %v1762_v21, %v1771_v36  ;;  %v1792_v13 = vshrl.u32 %v5066_v15, 16 }
  0x87   : > { %4539 = vmatprep.subr.bf16.mxu1 %v5194_v16  ;;  %v1797_v61 = vrot.slane %v1795_v63, 2  ;;  %v1806_v21 = vrot.slane %v1804_v9, 2 }
  0x88   : > { %v5239_v20 = vsel %vm2166_vm5, %v2200_v11, %v2202_v40  ;;  %v1785_v55 = vrot.slane %v1783_v45, 1  ;;  %v5268_v11 = vld [vmem:[%s4793_s25 + $0x18] sm:$0xff]   ;;  %v6159_v45 = vrot.slane %v5273_v4, 3 }
  0x89   : > { %v3368_v30 = vrot.slane %v5268_v11, 3 }
  0x8a   : > { %v1789_v0 = vor.u32 %v1788_v31, %v1785_v55  ;;  %v1425_v31 = vrot.slane %v5099_v33, 1 }
  0x8b   : > { %v5292_v55 = vsel %vm3366_vm7, %v3368_v30, %v6159_v45 }
  0x8c   : > { %4394 = vmatmul.mubr.msk.bf16.gmra.mxu1 %vm505_vm3, %v1414_v1  ;;  %v4080_v1 = vcombine.low %v3360_v53, %v5263_v17 }
  0x8d   : > { %4428 = vmatmul.mubr.msk.bf16.vlgmr.msra.gmra.mxu0 %vm505_vm3, %v1745_v47  ;;  %4397 = vmatprep.mubr.msk.bf16.mxu1 %vm505_vm3, %v1416_v37  ;;  %v1423_v47 = vrot.slane %v5095_v38, 1  ;;  %v1803_v37 = vrot.slane %v1801_v3, 1 }
  0x8e   : > { %4502 = vmatpush3.bf16.msra.mxu0 %v4981_v44  ;;  %4431 = vmatprep.mubr.msk.bf16.mxu0 %vm505_vm3, %v1754_v25  ;;  %v1417_v44 = vrot.slane %v5051_v6, 1  ;;  %v1780_v6 = vor.u32 %v1779_v58, %v1776_v57  ;;  %v1794_v25 = vrot.slane %v1792_v13, 1  ;;  %v3367_v38 = vrot.slane %v4080_v1, 3 }
  0x8f   : > { %4577 = vmatprep.subr.bf16.mxu0 %v5224_v27  ;;  %v1819_v58 = vshrl.u32 %v5120_v48, 16  ;;  %v1431_v1 = vrot.slane %v5147_v60, 1 }
  0x90   : > { %v1418_v59 = vsel %vm966_vm4, %v1415_v8, %v1417_v44  ;;  %v1420_v46 = vsel %vm966_vm4, %v1417_v44, %v1419_v51  ;;  %v1421_v8 = vrot.slane %v5066_v15, 1  ;;  %v1781_v24 = vsel %vm1719_vm6, %v1771_v36, %v1780_v6 }
  0x91   : > { %v1790_v40 = vsel %vm1719_vm6, %v1780_v6, %v1789_v0  ;;  %v1798_v49 = vor.u32 %v1797_v61, %v1794_v25  ;;  %v1810_v44 = vshrl.u32 %v5099_v33, 16  ;;  %v5284_v57 = vsel %vm3366_vm7, %v3367_v38, %v3368_v30 }
  0x92   : > { %v1422_v15 = vsel %vm966_vm4, %v1419_v51, %v1421_v8  ;;  %v1424_v36 = vsel %vm966_vm4, %v1421_v8, %v1423_v47  ;;  %v1807_v51 = vor.u32 %v1806_v21, %v1803_v37  ;;  %v1821_v3 = vrot.slane %v1819_v58, 1 }
  0x93   : > { %v1812_v6 = vrot.slane %v1810_v44, 1  ;;  %v1426_v8 = vsel %vm966_vm4, %v1423_v47, %v1425_v31  ;;  %v1837_v25 = vshrl.u32 %v5147_v60, 16  ;;  %v1840_v61 = vshll.u32 %v5147_v60, 16 }
  0x94   : > { %4398 = vmatmul.mubr.msk.bf16.gmra.mxu1 %vm505_vm3, %v1418_v59  ;;  %v1427_v59 = vrot.slane %v5120_v48, 1  ;;  %v1808_v63 = vsel %vm1719_vm6, %v1798_v49, %v1807_v51  ;;  %v1429_v47 = vrot.slane %v5124_v35, 1  ;;  %v1849_v60 = vshll.u32 %v5154_v5, 16 }
  0x95   : > { %4432 = vmatmul.mubr.msk.bf16.gmra.mxu0 %vm505_vm3, %v1763_v43  ;;  %4401 = vmatprep.mubr.msk.bf16.mxu1 %vm505_vm3, %v1420_v46  ;;  %v1813_v43 = vshll.u32 %v5099_v33, 16  ;;  %v1799_v46 = vsel %vm1719_vm6, %v1789_v0, %v1798_v49  ;;  %v1828_v33 = vshrl.u32 %v5124_v35, 16  ;;  %v1839_v38 = vrot.slane %v1837_v25, 1 }
  0x96   : > { %4435 = vmatprep.mubr.msk.bf16.mxu0 %vm505_vm3, %v1772_v52  ;;  %v1822_v52 = vshll.u32 %v5120_v48, 16  ;;  %v1428_v53 = vsel %vm966_vm4, %v1425_v31, %v1427_v59  ;;  %v1831_v48 = vshll.u32 %v5124_v35, 16  ;;  %v1842_v30 = vrot.slane %v1840_v61, 2 }
  0x97   : > { %v1815_v13 = vrot.slane %v1813_v43, 2  ;;  %v1830_v37 = vrot.slane %v1828_v33, 1  ;;  %v1432_v49 = vsel %vm966_vm4, %v1429_v47, %v1431_v1  ;;  %v1846_v35 = vshrl.u32 %v5154_v5, 16 }
  0x98   : > { %v1824_v9 = vrot.slane %v1822_v52, 2  ;;  %v1833_v21 = vrot.slane %v1831_v48, 2  ;;  %v1843_v43 = vor.u32 %v1842_v30, %v1839_v38  ;;  %v1858_v58 = vshll.u32 %v5177_v29, 16  ;;  %v4682_v38 = vld [vmem:[%s4793_s25 + $0x98] ss:$0 sps:$4 sm:$0x11]  }
  0x99   : > { %v1433_v52 = vrot.slane %v5154_v5, 1  ;;  %v1435_v31 = vrot.slane %v5177_v29, 1  ;;  %v1864_v5 = vshrl.u32 %v5180_v34, 16  ;;  %v1873_v33 = vshrl.u32 %v5215_v14, 16 }
  0x9a   : > { %v1825_v0 = vor.u32 %v1824_v9, %v1821_v3  ;;  %v1834_v44 = vor.u32 %v1833_v21, %v1830_v37  ;;  %v1860_v3 = vrot.slane %v1858_v58, 2  ;;  %v1876_v48 = vshll.u32 %v5215_v14, 16 }
  0x9b   : > { %v1434_v9 = vsel %vm966_vm4, %v1431_v1, %v1433_v52  ;;  %v1439_v25 = vrot.slane %v5215_v14, 1  ;;  %v1875_v37 = vrot.slane %v1873_v33, 1  ;;  %v1882_v14 = vshrl.u32 %v5220_v39, 16 }
  0x9c   : > { %4402 = vmatmul.mubr.msk.bf16.gmra.mxu1 %vm505_vm3, %v1422_v15  ;;  %v1878_v21 = vrot.slane %v1876_v48, 2 }
  0x9d   : > { %4436 = vmatmul.mubr.msk.bf16.gmra.mxu0 %vm505_vm3, %v1781_v24  ;;  %4405 = vmatprep.mubr.msk.bf16.mxu1 %vm505_vm3, %v1424_v36  ;;  %v1816_v24 = vor.u32 %v1815_v13, %v1812_v6  ;;  %v1430_v36 = vsel %vm966_vm4, %v1427_v59, %v1429_v47  ;;  %v1835_v59 = vsel %vm1719_vm6, %v1825_v0, %v1834_v44  ;;  %v1851_v6 = vrot.slane %v1849_v60, 2 }
  0x9e   : > { %4439 = vmatprep.mubr.msk.bf16.mxu0 %vm505_vm3, %v1790_v40  ;;  %v1844_v13 = vsel %vm1719_vm6, %v1834_v44, %v1843_v43  ;;  %v1866_v47 = vrot.slane %v1864_v5, 1  ;;  %v1441_v44 = vrot.slane %v4682_v38, 1  ;;  %v5397_v5 = vld [vmem:[%s4793_s25 + $0x40] sm:$0xff]  }
  0x9f   : > { %v1817_v40 = vsel %vm1719_vm6, %v1807_v51, %v1816_v24  ;;  %v1826_v15 = vsel %vm1719_vm6, %v1816_v24, %v1825_v0  ;;  %v1855_v51 = vshrl.u32 %v5177_v29, 16  ;;  %v1867_v29 = vshll.u32 %v5180_v34, 16 }
  0xa0   : > { %v1437_v0 = vrot.slane %v5180_v34, 1 }
  0xa1   : > { %v1869_v1 = vrot.slane %v1867_v29, 2 }
  0xa2   : > { %v1440_v30 = vsel %vm966_vm4, %v1437_v0, %v1439_v25 }
  0xa3   : > { %v1870_v34 = vor.u32 %v1869_v1, %v1866_v47  ;;  %v5423_v47 = vld [vmem:[%s4793_s25 + $0x50] sm:$0xff]  }
  0xa4   : > { %4406 = vmatmul.mubr.msk.bf16.gmra.mxu1 %vm505_vm3, %v1426_v8  ;;  %v1436_v8 = vsel %vm966_vm4, %v1433_v52, %v1435_v31 }
  0xa5   : > { %4440 = vmatmul.mubr.msk.bf16.gmra.mxu0 %vm505_vm3, %v1799_v46  ;;  %4409 = vmatprep.mubr.msk.bf16.mxu1 %vm505_vm3, %v1428_v53  ;;  %v1848_v46 = vrot.slane %v1846_v35, 1  ;;  %v2474_v35 = vld [vmem:[%s4793_s25 + $0x10] sm:$0xc] }
  0xa6   : > { %4443 = vmatprep.mubr.msk.bf16.mxu0 %vm505_vm3, %v1808_v63  ;;  %v1857_v63 = vrot.slane %v1855_v51, 1  ;;  %v5354_v52 = vcombine.low %v2474_v35, %v5263_v17 }
  0xa7   : > { %v1852_v53 = vor.u32 %v1851_v6, %v1848_v46  ;;  %v2607_v46 = vrot.slane %v5268_v11, 2 }
  0xa8   : > { %v1861_v24 = vor.u32 %v1860_v3, %v1857_v63  ;;  %v2609_v63 = vrot.slane %v5273_v4, 2 }
  0xa9   : > { %v1853_v61 = vsel %vm1719_vm6, %v1843_v43, %v1852_v53  ;;  %v1884_v43 = vrot.slane %v1882_v14, 1 }
  0xaa   : > { %v1871_v60 = vsel %vm1719_vm6, %v1861_v24, %v1870_v34 }
  0xac   : > { %4410 = vmatmul.mubr.msk.bf16.gmra.mxu1 %vm505_vm3, %v1430_v36  ;;  %v1885_v36 = vshll.u32 %v5220_v39, 16 }
  0xad   : > { %4444 = vmatmul.mubr.msk.bf16.gmra.mxu0 %vm505_vm3, %v1817_v40  ;;  %4413 = vmatprep.mubr.msk.bf16.mxu1 %vm505_vm3, %v1432_v49  ;;  %v1862_v40 = vsel %vm1719_vm6, %v1852_v53, %v1861_v24  ;;  %v1879_v49 = vor.u32 %v1878_v21, %v1875_v37  ;;  %v5384_v53 = vld [vmem:[%s4793_s25 + $0x38] sm:$0xff]  }
  0xae   : > { %4447 = vmatprep.mubr.msk.bf16.mxu0 %vm505_vm3, %v1826_v15  ;;  %v1438_v15 = vsel %vm966_vm4, %v1435_v31, %v1437_v0  ;;  %v1887_v51 = vrot.slane %v1885_v36, 2  ;;  %v1442_v31 = vsel %vm966_vm4, %v1439_v25, %v1441_v44  ;;  %v5431_v37 = vld [vmem:[%s4793_s25 + $0x58] sm:$0xff]   ;;  %v5455_v44 = vld [vmem:[%s4793_s25 + $0x60] sm:$0xff]  }
  0xaf   : > { %v1880_v58 = vsel %vm1719_vm6, %v1870_v34, %v1879_v49  ;;  %v2623_v34 = vrot.slane %v5431_v37, 2 }
  0xb0   : > { %v1888_v39 = vor.u32 %v1887_v51, %v1884_v43  ;;  %v5463_v43 = vld [vmem:[%s4793_s25 + $0x68] sm:$0xff]  }
  0xb2   : > { %v1889_v17 = vsel %vm1719_vm6, %v1879_v49, %v1888_v39 }
  0xb4   : > { %4414 = vmatmul.mubr.msk.bf16.gmra.mxu1 %vm505_vm3, %v1434_v9  ;;  %v5380_v9 = vld [vmem:[%s4793_s25 + $0x30] sm:$0xff]  }
  0xb5   : > { %4448 = vmatmul.mubr.msk.bf16.gmra.mxu0 %vm505_vm3, %v1835_v59  ;;  %4417 = vmatprep.mubr.msk.bf16.mxu1 %vm505_vm3, %v1436_v8  ;;  %v2606_v59 = vrot.slane %v5354_v52, 2 }
  0xb6   : > { %4451 = vmatprep.mubr.msk.bf16.mxu0 %vm505_vm3, %v1844_v13  ;;  %v5367_v13 = vld [vmem:[%s4793_s25 + $0x28] sm:$0xff]  }
  0xb7   : > { %v2608_v6 = vsel %vm2166_vm5, %v2606_v59, %v2607_v46  ;;  %v2611_v3 = vrot.slane %v5367_v13, 2  ;;  %v2627_v59 = vrot.slane %v5463_v43, 2 }
  0xb9   : > { %v2612_v8 = vsel %vm2166_vm5, %v2609_v63, %v2611_v3 }
  0xbc   : > { %4418 = vmatmul.mubr.msk.bf16.gmra.mxu1 %vm505_vm3, %v1438_v15  ;;  %v2621_v15 = vrot.slane %v5423_v47, 2 }
  0xbd   : > { %4452 = vmatmul.mubr.msk.bf16.gmra.mxu0 %vm505_vm3, %v1853_v61  ;;  %4421 = vmatprep.mubr.msk.bf16.mxu1 %vm505_vm3, %v1440_v30 }
  0xbe   : > { %4455 = vmatprep.mubr.msk.bf16.mxu0 %vm505_vm3, %v1862_v40 }
  0xc4   : > { %4422 = vmatmul.mubr.msk.bf16.gmra.mxu1 %vm505_vm3, %v1442_v31 }
  0xc5   : > { %4456 = vmatmul.mubr.msk.bf16.gmra.mxu0 %vm505_vm3, %v1871_v60  ;;  %4465 = vmatprep.mubr.msk.bf16.mxu1 %vm505_vm3, %v5036_v62  ;;  %v2610_v62 = vsel %vm2166_vm5, %v2607_v46, %v2609_v63  ;;  %v5487_v63 = vld [vmem:[%s4793_s25 + $0x70] sm:$0xff]  }
  0xc6   : > { %4459 = vmatprep.mubr.msk.bf16.mxu0 %vm505_vm3, %v1880_v58  ;;  %v2625_v58 = vrot.slane %v5455_v44, 2 }
  0xcc   : > { %4466 = vmatmul.mubr.msk.bf16.vlgmr.msra.gmra.mxu1 %vm505_vm3, %v5045_v2  ;;  %v2613_v2 = vrot.slane %v5380_v9, 2 }
  0xcd   : > { %4460 = vmatmul.mubr.msk.bf16.gmra.mxu0 %vm505_vm3, %v1889_v17  ;;  %4540 = vmatpush3.bf16.msra.mxu1 %v5194_v16 }
  0xce   : > { %4503 = vmatprep.mubr.msk.bf16.mxu0 %vm505_vm3, %v2608_v6  ;;  %4469 = vmatprep.mubr.msk.bf16.mxu1 %vm505_vm3, %v5054_v7  ;;  %v2615_v7 = vrot.slane %v5384_v53, 2  ;;  %v2614_v16 = vsel %vm2166_vm5, %v2611_v3, %v2613_v2  ;;  %v2626_v6 = vsel %vm2166_vm5, %v2623_v34, %v2625_v58 }
  0xd0   : > { %v2616_v29 = vsel %vm2166_vm5, %v2613_v2, %v2615_v7 }
  0xd4   : > { %4470 = vmatmul.mubr.msk.bf16.gmra.mxu1 %vm505_vm3, %v5069_v18  ;;  %v2617_v18 = vrot.slane %v5397_v5, 2 }
  0xd5   : > { %4504 = vmatmul.mubr.msk.bf16.vlgmr.msra.gmra.mxu0 %vm505_vm3, %v2610_v62  ;;  %4473 = vmatprep.mubr.msk.bf16.mxu1 %vm505_vm3, %v5072_v22 }
  0xd6   : > { %4578 = vmatpush3.bf16.msra.mxu0 %v5224_v27  ;;  %4507 = vmatprep.mubr.msk.bf16.mxu0 %vm505_vm3, %v2612_v8  ;;  %v5401_v27 = vld [vmem:[%s4793_s25 + $0x48] sm:$0xff]   ;;  %v2618_v61 = vsel %vm2166_vm5, %v2615_v7, %v2617_v18  ;;  %v5495_v8 = vld [vmem:[%s4793_s25 + $0x78] sm:$0xff]   ;;  %v2629_v7 = vrot.slane %v5487_v63, 2 }
  0xd7   : > { %v2619_v48 = vrot.slane %v5401_v27, 2 }
  0xd9   : > { %v2622_v49 = vsel %vm2166_vm5, %v2619_v48, %v2621_v15 }
  0xdc   : > { %v5408_v33 = vpop.f32.mrf.mxu1  ;;  %4474 = vmatmul.mubr.msk.bf16.gmra.mxu1 %vm505_vm3, %v5076_v23  ;;  %v2620_v23 = vsel %vm2166_vm5, %v2617_v18, %v2619_v48  ;;  %v2631_v18 = vrot.slane %v5495_v8, 2 }
  0xdd   : > { %v5403_v24 = vpop.f32.mrf.mxu0  ;;  %4508 = vmatmul.mubr.msk.bf16.gmra.mxu0 %vm505_vm3, %v2614_v16  ;;  %4477 = vmatprep.mubr.msk.bf16.mxu1 %vm505_vm3, %v5084_v28 }
  0xde   : > { %4511 = vmatprep.mubr.msk.bf16.mxu0 %vm505_vm3, %v2616_v29  ;;  %v5417_v0 = vpop.f32.mrf.mxu1 }
  0xdf   : > { %v5412_v22 = vpop.f32.mrf.mxu0 }
  0xe0   : > { %v5425_v1 = vpop.f32.mrf.mxu1 }
  0xe1   : > { %v5419_v25 = vpop.f32.mrf.mxu0 }
  0xe2   : > { %v5433_v21 = vpop.f32.mrf.mxu1 }
  0xe3   : > { %v5427_v40 = vpop.f32.mrf.mxu0 }
  0xe4   : > { %v5440_v38 = vpop.f32.mrf.mxu1  ;;  %4478 = vmatmul.mubr.msk.bf16.gmra.mxu1 %vm505_vm3, %v5087_v32  ;;  %v2624_v32 = vsel %vm2166_vm5, %v2621_v15, %v2623_v34  ;;  %v5519_v15 = vld [vmem:[%s4793_s25 + $0x80] sm:$0xff]  }
  0xe5   : > { %v5435_v28 = vpop.f32.mrf.mxu0  ;;  %4512 = vmatmul.mubr.msk.bf16.gmra.mxu0 %vm505_vm3, %v2618_v61  ;;  %4481 = vmatprep.mubr.msk.bf16.mxu1 %vm505_vm3, %v5106_v42  ;;  %6174 = vst [vmem:[#allocation10_spill] sm:$0xff] %v5519_v15 }
  0xe6   : > { %4515 = vmatprep.mubr.msk.bf16.mxu0 %vm505_vm3, %v2620_v23  ;;  %v5449_v14 = vpop.f32.mrf.mxu1  ;;  %v2630_v23 = vsel %vm2166_vm5, %v2627_v59, %v2629_v7 }
  0xe7   : > { %v5444_v30 = vpop.f32.mrf.mxu0 }
  0xe8   : > { %v5457_v35 = vpop.f32.mrf.mxu1 }
  0xe9   : > { %v5451_v36 = vpop.f32.mrf.mxu0  ;;  %6166 = vst [vmem:[#allocation2_spill] sm:$0xff] %v5457_v35 }
  0xea   : > { %v5465_v51 = vpop.f32.mrf.mxu1 }
  0xeb   : > { %v5459_v60 = vpop.f32.mrf.mxu0  ;;  %6167 = vst [vmem:[#allocation3_spill] sm:$0xff] %v5465_v51 }
  0xec   : > { %v5472_v31 = vpop.f32.mrf.mxu1  ;;  %4482 = vmatmul.mubr.msk.bf16.gmra.mxu1 %vm505_vm3, %v5111_v12  ;;  %v2628_v12 = vsel %vm2166_vm5, %v2625_v58, %v2627_v59 }
  0xed   : > { %v5467_v42 = vpop.f32.mrf.mxu0  ;;  %4516 = vmatmul.mubr.msk.bf16.gmra.mxu0 %vm505_vm3, %v2622_v49  ;;  %6168 = vst [vmem:[#allocation4_spill] sm:$0xff] %v5472_v31  ;;  %4485 = vmatprep.mubr.msk.bf16.mxu1 %vm505_vm3, %v5132_v50 }
  0xee   : > { %4519 = vmatprep.mubr.msk.bf16.mxu0 %vm505_vm3, %v2624_v32  ;;  %v5481_v46 = vpop.f32.mrf.mxu1  ;;  %v5527_v32 = vld [vmem:[%s4793_s25 + $0x88] sm:$0xff]  }
  0xef   : > { %v5476_v39 = vpop.f32.mrf.mxu0  ;;  %6169 = vst [vmem:[#allocation5_spill] sm:$0xff] %v5481_v46  ;;  %6176 = vst [vmem:[#allocation12_spill] sm:$0xff] %v5527_v32  ;;  %v5559_v46 = vld [vmem:[%s4793_s25 + $0x98] sm:$0xff]  }
  0xf0   : > { %v5489_v3 = vpop.f32.mrf.mxu1  ;;  %6178 = vst [vmem:[#allocation14_spill] sm:$0xff] %v5559_v46 }
  0xf1   : > { %v5483_v17 = vpop.f32.mrf.mxu0  ;;  %6170 = vst [vmem:[#allocation6_spill] sm:$0xff] %v5489_v3  ;;  %v5553_v3 = vld [vmem:[%s4793_s25 + $0x90] sm:$0xff]  }
  0xf2   : > { %v5497_v2 = vpop.f32.mrf.mxu1 }
  0xf3   : > { %v5491_v62 = vpop.f32.mrf.mxu0  ;;  %6171 = vst [vmem:[#allocation7_spill] sm:$0xff] %v5497_v2 }
  0xf4   : > { %v5504_v16 = vpop.f32.mrf.mxu1  ;;  %4486 = vmatmul.mubr.msk.bf16.gmra.mxu1 %vm505_vm3, %v5137_v54  ;;  %v2632_v54 = vsel %vm2166_vm5, %v2629_v7, %v2631_v18  ;;  %v2635_v7 = vrot.slane %v5527_v32, 2 }
  0xf5   : > { %v5499_v50 = vpop.f32.mrf.mxu0  ;;  %4520 = vmatmul.mubr.msk.bf16.gmra.mxu0 %vm505_vm3, %v2626_v6  ;;  %6172 = vst [vmem:[#allocation8_spill] sm:$0xff] %v5504_v16  ;;  %4489 = vmatprep.mubr.msk.bf16.mxu1 %vm505_vm3, %v5161_v19  ;;  %v2633_v19 = vrot.slane %v5519_v15, 2 }
  0xf6   : > { %4523 = vmatprep.mubr.msk.bf16.mxu0 %vm505_vm3, %v2628_v12  ;;  %v5513_v48 = vpop.f32.mrf.mxu1 }
  0xf7   : > { %v5508_v29 = vpop.f32.mrf.mxu0  ;;  %6173 = vst [vmem:[#allocation9_spill] sm:$0xff] %v5513_v48  ;;  %v2929_v48 = vshrl.u32 %v5268_v11, 16  ;;  %v2634_v2 = vsel %vm2166_vm5, %v2631_v18, %v2633_v19 }
  0xf8   : > { %v5521_v34 = vpop.f32.mrf.mxu1 }
  0xf9   : > { %v5515_v61 = vpop.f32.mrf.mxu0  ;;  %6175 = vst [vmem:[#allocation11_spill] sm:$0xff] %v5521_v34  ;;  %v2924_v34 = vshll.u32 %v5354_v52, 16 }
  0xfa   : > { %v5529_v58 = vpop.f32.mrf.mxu1 }
  0xfb   : > { %v5523_v49 = vpop.f32.mrf.mxu0  ;;  %6177 = vst [vmem:[#allocation13_spill] sm:$0xff] %v5529_v58  ;;  %v2926_v32 = vrot.slane %v2924_v34, 3 }
  0xfc   : > { %v4315_v59 = vpop.f32.mrf.mxu1  ;;  %4490 = vmatmul.mubr.msk.bf16.gmra.mxu1 %vm505_vm3, %v5167_v26  ;;  %v2932_v26 = vshll.u32 %v5268_v11, 16 }
  0xfd   : > { %v5531_v6 = vpop.f32.mrf.mxu0  ;;  %4524 = vmatmul.mubr.msk.bf16.gmra.mxu0 %vm505_vm3, %v2630_v23  ;;  %v826_v45 = vadd.f32 %v4315_v59, %v5403_v24  ;;  %4493 = vmatprep.mubr.msk.bf16.mxu1 %vm505_vm3, %v5197_v56  ;;  %v2636_v56 = vsel %vm2166_vm5, %v2633_v19, %v2635_v7  ;;  %v2637_v19 = vrot.slane %v5553_v3, 2 }
  0xfe   : > { %4527 = vmatprep.mubr.msk.bf16.mxu0 %vm505_vm3, %v2632_v54  ;;  %v817_v23 = vpop.f32.mrf.mxu1  ;;  %v2921_v54 = vshrl.u32 %v5354_v52, 16 }
  0xff   : > { %v5538_v12 = vpop.f32.mrf.mxu0  ;;  %v818_v16 = vadd.f32 %v817_v23, %v5412_v22  ;;  %v2931_v22 = vrot.slane %v2929_v48, 2  ;;  %v2934_v23 = vrot.slane %v2932_v26, 3 }
 0x100   : > { %v4316_v24 = vpop.f32.mrf.mxu1  ;;  %v2923_v11 = vrot.slane %v2921_v54, 2 }
 0x101   : > { %v5544_v58 = vpop.f32.mrf.mxu0  ;;  %v829_v31 = vadd.f32 %v4316_v24, %v5419_v25  ;;  %v2639_v24 = vrot.slane %v5559_v46, 2  ;;  %v2935_v26 = vor.u32 %v2934_v23, %v2931_v22 }
 0x102   : > { %v820_v52 = vpop.f32.mrf.mxu1  ;;  %v2927_v54 = vor.u32 %v2926_v32, %v2923_v11 }
 0x103   : > { %v5555_v59 = vpop.f32.mrf.mxu0  ;;  %v821_v18 = vadd.f32 %v820_v52, %v5427_v40  ;;  %v2941_v40 = vshll.u32 %v5273_v4, 16 }
 0x104   : > { %v4319_v35 = vpop.f32.mrf.mxu1  ;;  %4494 = vmatmul.mubr.msk.bf16.gmra.mxu1 %vm505_vm3, %v5203_v10  ;;  %v2947_v10 = vshrl.u32 %v5367_v13, 16 }
 0x105   : > { %v4353_v51 = vpop.f32.mrf.mxu0  ;;  %4528 = vmatmul.mubr.msk.bf16.gmra.mxu0 %vm505_vm3, %v2634_v2  ;;  %v842_v2 = vadd.f32 %v4319_v35, %v5435_v28  ;;  %4497 = vmatprep.mubr.msk.bf16.mxu1 %vm505_vm3, %v5232_v41  ;;  %v2638_v35 = vsel %vm2166_vm5, %v2635_v7, %v2637_v19  ;;  %v4703_v41 = vld [vmem:[%s4793_s25 + $0xa0] ss:$0 sps:$4 sm:$0x33]   ;;  %v2943_v22 = vrot.slane %v2941_v40, 3  ;;  %v2959_v40 = vshll.u32 %v5380_v9, 16 }
 0x106   : > { %v5564_v15 = vadd.f32 %v4353_v51, %v826_v45  ;;  %4531 = vmatprep.mubr.msk.bf16.mxu0 %vm505_vm3, %v2636_v56  ;;  %v2938_v45 = vshrl.u32 %v5273_v4, 16  ;;  %v833_v51 = vpop.f32.mrf.mxu1  ;;  %v2950_v56 = vshll.u32 %v5367_v13, 16 }
 0x107   : > { %v1095_v25 = vpop.f32.mrf.mxu0  ;;  %v834_v52 = vadd.f32 %v833_v51, %v5444_v30  ;;  %v2936_v30 = vsel %vm2919_vm8, %v2927_v54, %v2935_v26 }
 0x108   : > { %6179 = vst [vmem:[#allocation15_spill] sm:$0xff] %v5564_v15  ;;  %v5572_v48 = vadd.f32 %v1095_v25, %v818_v16  ;;  %v4320_v16 = vpop.f32.mrf.mxu1  ;;  %v2940_v11 = vrot.slane %v2938_v45, 2  ;;  %v2952_v7 = vrot.slane %v2950_v56, 3  ;;  %v2956_v45 = vshrl.u32 %v5380_v9, 16 }
 0x109   : > { %v4354_v34 = vpop.f32.mrf.mxu0  ;;  %v845_v15 = vadd.f32 %v4320_v16, %v5451_v36  ;;  %v2965_v56 = vshrl.u32 %v5384_v53, 16 }
 0x10a   : > { %6180 = vst [vmem:[#allocation16_spill] sm:$0xff] %v5572_v48  ;;  %v5581_v28 = vadd.f32 %v4354_v34, %v829_v31  ;;  %v2640_v48 = vsel %vm2166_vm5, %v2637_v19, %v2639_v24  ;;  %v836_v23 = vpop.f32.mrf.mxu1  ;;  %v2949_v31 = vrot.slane %v2947_v10, 2  ;;  %v2641_v19 = vrot.slane %v4703_v41, 2 }
 0x10b   : > { %v1098_v25 = vpop.f32.mrf.mxu0  ;;  %v837_v51 = vadd.f32 %v836_v23, %v5459_v60  ;;  %v2944_v60 = vor.u32 %v2943_v22, %v2940_v11  ;;  %v2961_v23 = vrot.slane %v2959_v40, 3 }
 0x10c   : > { %v5587_v32 = vadd.f32 %v1098_v25, %v821_v18  ;;  %v4323_v36 = vpop.f32.mrf.mxu1  ;;  %4498 = vmatmul.mubr.msk.bf16.gmra.mxu1 %vm505_vm3, %v5239_v20  ;;  %v2642_v16 = vsel %vm2166_vm5, %v2639_v24, %v2641_v19 }
 0x10d   : > { %v4357_v46 = vpop.f32.mrf.mxu0  ;;  %4532 = vmatmul.mubr.msk.bf16.gmra.mxu0 %vm505_vm3, %v2638_v35  ;;  %v858_v54 = vadd.f32 %v4323_v36, %v5467_v42  ;;  %4541 = vmatprep.mubr.msk.bf16.mxu1 %vm505_vm3, %v2936_v30  ;;  %v2968_v35 = vshll.u32 %v5384_v53, 16  ;;  %v2945_v22 = vsel %vm2919_vm8, %v2935_v26, %v2944_v60 }
 0x10e   : > { %v5592_v34 = vadd.f32 %v4357_v46, %v842_v2  ;;  %4535 = vmatprep.mubr.msk.bf16.mxu0 %vm505_vm3, %v2640_v48  ;;  %v849_v46 = vpop.f32.mrf.mxu1  ;;  %v2953_v48 = vor.u32 %v2952_v7, %v2949_v31 }
 0x10f   : > { %v1111_v18 = vpop.f32.mrf.mxu0  ;;  %v850_v20 = vadd.f32 %v849_v46, %v5476_v39  ;;  %v2970_v36 = vrot.slane %v2968_v35, 3 }
 0x110   : > { %v5600_v10 = vadd.f32 %v1111_v18, %v834_v52  ;;  %v4324_v25 = vpop.f32.mrf.mxu1  ;;  %v2958_v52 = vrot.slane %v2956_v45, 2  ;;  %v2954_v39 = vsel %vm2919_vm8, %v2944_v60, %v2953_v48  ;;  %v3372_v18 = vrot.slane %v5367_v13, 3 }
 0x111   : > { %v4358_v2 = vpop.f32.mrf.mxu0  ;;  %v861_v30 = vadd.f32 %v4324_v25, %v5483_v17  ;;  %v6181_v25 = vrot.slane %v5273_v4, 3 }
 0x112   : > { %v5606_v41 = vadd.f32 %v4358_v2, %v845_v15  ;;  %v852_v31 = vpop.f32.mrf.mxu1  ;;  %v2967_v15 = vrot.slane %v2965_v56, 2  ;;  %v2962_v26 = vor.u32 %v2961_v23, %v2958_v52  ;;  %v2983_v2 = vshrl.u32 %v5401_v27, 16 }
 0x113   : > { %v1114_v42 = vpop.f32.mrf.mxu0  ;;  %v853_v24 = vadd.f32 %v852_v31, %v5491_v62  ;;  %v2974_v62 = vshrl.u32 %v5397_v5, 16  ;;  %v2986_v56 = vshll.u32 %v5401_v27, 16 }
 0x114   : > { %v5610_v11 = vadd.f32 %v1114_v42, %v837_v51  ;;  %v4327_v17 = vpop.f32.mrf.mxu1  ;;  %4542 = vmatmul.mubr.msk.bf16.vlgmr.msra.gmra.mxu1 %vm505_vm3, %v2945_v22  ;;  %v3373_v42 = vsel %vm3366_vm7, %v6181_v25, %v3372_v18 }
 0x115   : > { %v4361_v7 = vpop.f32.mrf.mxu0  ;;  %4536 = vmatmul.mubr.msk.bf16.gmra.mxu0 %vm505_vm3, %v2642_v16  ;;  %v874_v45 = vadd.f32 %v4327_v17, %v5499_v50  ;;  %4545 = vmatprep.mubr.msk.bf16.mxu1 %vm505_vm3, %v2954_v39  ;;  %v2963_v16 = vsel %vm2919_vm8, %v2953_v48, %v2962_v26  ;;  %v2976_v22 = vrot.slane %v2974_v62, 2  ;;  %v3376_v17 = vrot.slane %v5384_v53, 3 }
 0x116   : > { %v5616_v19 = vadd.f32 %v4361_v7, %v858_v54  ;;  %4579 = vmatprep.mubr.msk.bf16.mxu0 %vm505_vm3, %v5284_v57  ;;  %v2977_v54 = vshll.u32 %v5397_v5, 16  ;;  %v865_v60 = vpop.f32.mrf.mxu1  ;;  %v2971_v57 = vor.u32 %v2970_v36, %v2967_v15  ;;  %v2988_v15 = vrot.slane %v2986_v56, 3 }
 0x117   : > { %v1127_v51 = vpop.f32.mrf.mxu0  ;;  %v866_v35 = vadd.f32 %v865_v60, %v5508_v29  ;;  %v3001_v60 = vshrl.u32 %v5431_v37, 16 }
 0x118   : > { %v5623_v40 = vadd.f32 %v1127_v51, %v850_v20  ;;  %v4328_v50 = vpop.f32.mrf.mxu1  ;;  %v2979_v31 = vrot.slane %v2977_v54, 3  ;;  %v2972_v29 = vsel %vm2919_vm8, %v2962_v26, %v2971_v57  ;;  %v2995_v51 = vshll.u32 %v5423_v47, 16 }
 0x119   : > { %v4362_v46 = vpop.f32.mrf.mxu0  ;;  %v877_v52 = vadd.f32 %v4328_v50, %v5515_v61  ;;  %v3374_v61 = vrot.slane %v5380_v9, 3 }
 0x11a   : > { %v5631_v13 = vadd.f32 %v4362_v46, %v861_v30  ;;  %v868_v7 = vpop.f32.mrf.mxu1  ;;  %v2985_v30 = vrot.slane %v2983_v2, 2  ;;  %v3004_v46 = vshll.u32 %v5431_v37, 16 }
 0x11b   : > { %v1130_v20 = vpop.f32.mrf.mxu0  ;;  %v869_v48 = vadd.f32 %v868_v7, %v5523_v49  ;;  %v2980_v49 = vor.u32 %v2979_v31, %v2976_v22  ;;  %v3375_v56 = vsel %vm3366_vm7, %v3372_v18, %v3374_v61 }
 0x11c   : > { %v5638_v23 = vadd.f32 %v1130_v20, %v853_v24  ;;  %v4331_v36 = vpop.f32.mrf.mxu1  ;;  %4546 = vmatmul.mubr.msk.bf16.gmra.mxu1 %vm505_vm3, %v2963_v16  ;;  %v2989_v9 = vor.u32 %v2988_v15, %v2985_v30  ;;  %v2997_v16 = vrot.slane %v2995_v51, 3  ;;  %v3006_v18 = vrot.slane %v3004_v46, 3 }
 0x11d   : > { %v4365_v39 = vpop.f32.mrf.mxu0  ;;  %4580 = vmatmul.mubr.msk.bf16.vlgmr.msra.gmra.mxu0 %vm505_vm3, %v5292_v55  ;;  %v2992_v55 = vshrl.u32 %v5423_v47, 16  ;;  %v890_v26 = vadd.f32 %v4331_v36, %v5531_v6  ;;  %4549 = vmatprep.mubr.msk.bf16.mxu1 %vm505_vm3, %v2972_v29  ;;  %v2981_v22 = vsel %vm2919_vm8, %v2971_v57, %v2980_v49  ;;  %v3010_v36 = vshrl.u32 %v5455_v44, 16 }
 0x11e   : > { %v5644_v4 = vadd.f32 %v4365_v39, %v874_v45  ;;  %4583 = vmatprep.mubr.msk.bf16.mxu0 %vm505_vm3, %v3373_v42  ;;  %v881_v45 = vpop.f32.mrf.mxu1 }
 0x11f   : > { %v1143_v24 = vpop.f32.mrf.mxu0  ;;  %v882_v53 = vadd.f32 %v881_v45, %v5538_v12  ;;  %v2994_v20 = vrot.slane %v2992_v55, 2  ;;  %v2990_v12 = vsel %vm2919_vm8, %v2980_v49, %v2989_v9 }
 0x120   : > { %v5653_v62 = vadd.f32 %v1143_v24, %v866_v35  ;;  %v4332_v50 = vpop.f32.mrf.mxu1  ;;  %v3377_v35 = vsel %vm3366_vm7, %v3374_v61, %v3376_v17 }
 0x121   : > { %v4366_v54 = vpop.f32.mrf.mxu0  ;;  %v893_v25 = vadd.f32 %v4332_v50, %v5544_v58  ;;  %v3378_v58 = vrot.slane %v5397_v5, 3  ;;  %v2998_v15 = vor.u32 %v2997_v16, %v2994_v20  ;;  %v3019_v5 = vshrl.u32 %v5463_v43, 16 }
 0x122   : > { %v5659_v2 = vadd.f32 %v4366_v54, %v877_v52  ;;  %v884_v31 = vpop.f32.mrf.mxu1  ;;  %v3003_v52 = vrot.slane %v3001_v60, 2  ;;  %v3012_v50 = vrot.slane %v3010_v36, 2  ;;  %v3040_v36 = vshll.u32 %v5495_v8, 16 }
 0x123   : > { %v1146_v6 = vpop.f32.mrf.mxu0  ;;  %v885_v39 = vadd.f32 %v884_v31, %v5555_v59  ;;  %v3013_v59 = vshll.u32 %v5455_v44, 16  ;;  %v3379_v45 = vsel %vm3366_vm7, %v3376_v17, %v3378_v58  ;;  %v2999_v60 = vsel %vm2919_vm8, %v2989_v9, %v2998_v15 }
 0x124   : > { %v5664_v42 = vadd.f32 %v1146_v6, %v869_v48  ;;  %v4335_v30 = vpop.f32.mrf.mxu1  ;;  %4550 = vmatmul.mubr.msk.bf16.gmra.mxu1 %vm505_vm3, %v2981_v22  ;;  %v3380_v48 = vrot.slane %v5401_v27, 3  ;;  %v3007_v51 = vor.u32 %v3006_v18, %v3003_v52  ;;  %v3028_v52 = vshrl.u32 %v5487_v63, 16 }
 0x125   : > { %v4369_v7 = vpop.f32.mrf.mxu0  ;;  %4584 = vmatmul.mubr.msk.bf16.gmra.mxu0 %vm505_vm3, %v3375_v56  ;;  %4553 = vmatprep.mubr.msk.bf16.mxu1 %vm505_vm3, %v2990_v12  ;;  %v3015_v6 = vrot.slane %v3013_v59, 3  ;;  %v3384_v12 = vrot.slane %v5431_v37, 3  ;;  %v3031_v18 = vshll.u32 %v5487_v63, 16 }
 0x126   : > { %v5670_v29 = vadd.f32 %v4369_v7, %v890_v26  ;;  %4587 = vmatprep.mubr.msk.bf16.mxu0 %vm505_vm3, %v3377_v35  ;;  %v897_v24 = vpop.f32.mrf.mxu1  ;;  %v3022_v26 = vshll.u32 %v5463_v43, 16  ;;  %v3381_v46 = vsel %vm3366_vm7, %v3378_v58, %v3380_v48  ;;  %v3008_v16 = vsel %vm2919_vm8, %v2998_v15, %v3007_v51 }
 0x127   : > { %v1159_v57 = vpop.f32.mrf.mxu0  ;;  %v898_v22 = vadd.f32 %v897_v24, %v5417_v0  ;;  %v3016_v0 = vor.u32 %v3015_v6, %v3012_v50  ;;  %v3037_v15 = vshrl.u32 %v5495_v8, 16 }
 0x128   : > { %v5676_v61 = vadd.f32 %v1159_v57, %v882_v53  ;;  %v4336_v27 = vpop.f32.mrf.mxu1  ;;  %v906_v53 = vadd.f32 %v4335_v30, %v5408_v33  ;;  %v3024_v17 = vrot.slane %v3022_v26, 3  ;;  %v3382_v33 = vrot.slane %v5423_v47, 3 }
 0x129   : > { %v4370_v55 = vpop.f32.mrf.mxu0  ;;  %v3030_v26 = vrot.slane %v3028_v52, 2  ;;  %v3039_v50 = vrot.slane %v3037_v15, 2 }
 0x12a   : > { %v5683_v49 = vadd.f32 %v4370_v55, %v893_v25  ;;  %v900_v35 = vpop.f32.mrf.mxu1  ;;  %v3021_v25 = vrot.slane %v3019_v5, 2  ;;  %v3383_v24 = vsel %vm3366_vm7, %v3380_v48, %v3382_v33  ;;  %v3385_v5 = vsel %vm3366_vm7, %v3382_v33, %v3384_v12 }
 0x12b   : > { %v1162_v54 = vpop.f32.mrf.mxu0  ;;  %v901_v37 = vadd.f32 %v900_v35, %v5433_v21  ;;  %v3042_v48 = vrot.slane %v3040_v36, 3 }
 0x12c   : > { %v5689_v56 = vadd.f32 %v1162_v54, %v885_v39  ;;  %v4339_v9 = vpop.f32.mrf.mxu1  ;;  %4554 = vmatmul.mubr.msk.bf16.gmra.mxu1 %vm505_vm3, %v2999_v60  ;;  %v909_v39 = vadd.f32 %v4336_v27, %v5425_v1  ;;  %v3025_v47 = vor.u32 %v3024_v17, %v3021_v25  ;;  %v3017_v60 = vsel %vm2919_vm8, %v3007_v51, %v3016_v0  ;;  %v6182_v17 = vld [vmem:[#allocation2_spill] sm:$0xff] }
 0x12d   : > { %v4373_v20 = vpop.f32.mrf.mxu0  ;;  %4588 = vmatmul.mubr.msk.bf16.gmra.mxu0 %vm505_vm3, %v3379_v45  ;;  %4557 = vmatprep.mubr.msk.bf16.mxu1 %vm505_vm3, %v3008_v16  ;;  %v3033_v45 = vrot.slane %v3031_v18, 3  ;;  %v922_v27 = vadd.f32 %v4339_v9, %v5440_v38  ;;  %v3386_v38 = vrot.slane %v5455_v44, 3  ;;  %v3388_v25 = vrot.slane %v5463_v43, 3 }
 0x12e   : > { %v5694_v31 = vadd.f32 %v4373_v20, %v906_v53  ;;  %4591 = vmatprep.mubr.msk.bf16.mxu0 %vm505_vm3, %v3381_v46  ;;  %v913_v30 = vpop.f32.mrf.mxu1  ;;  %v3026_v21 = vsel %vm2919_vm8, %v3016_v0, %v3025_v47  ;;  %v3043_v44 = vor.u32 %v3042_v48, %v3039_v50  ;;  %v6187_v48 = vld [vmem:[#allocation5_spill] sm:$0xff] }
 0x12f   : > { %v1175_v7 = vpop.f32.mrf.mxu0  ;;  %v914_v6 = vadd.f32 %v913_v30, %v5449_v14  ;;  %v3034_v16 = vor.u32 %v3033_v45, %v3030_v26  ;;  %v6183_v14 = vld [vmem:[#allocation10_spill] sm:$0xff]  ;;  %v3387_v36 = vsel %vm3366_vm7, %v3384_v12, %v3386_v38 }
 0x130   : > { %v5703_v58 = vadd.f32 %v1175_v7, %v898_v22  ;;  %v4340_v55 = vpop.f32.mrf.mxu1  ;;  %v3046_v9 = vshrl.u32 %v6183_v14, 16  ;;  %v3049_v7 = vshll.u32 %v6183_v14, 16 }
 0x131   : > { %v4374_v57 = vpop.f32.mrf.mxu0  ;;  %v925_v22 = vadd.f32 %v4340_v55, %v6182_v17  ;;  %v3035_v55 = vsel %vm2919_vm8, %v3025_v47, %v3034_v16  ;;  %v3390_v47 = vrot.slane %v5487_v63, 3  ;;  %v3392_v17 = vrot.slane %v5495_v8, 3  ;;  %v6190_v8 = vld [vmem:[#allocation7_spill] sm:$0xff] }
 0x132   : > { %v5709_v59 = vadd.f32 %v4374_v57, %v909_v39  ;;  %v916_v46 = vpop.f32.mrf.mxu1  ;;  %v6184_v39 = vld [vmem:[#allocation12_spill] sm:$0xff]  ;;  %v6185_v57 = vld [vmem:[#allocation3_spill] sm:$0xff] }
 0x133   : > { %v1178_v1 = vpop.f32.mrf.mxu0  ;;  %v3055_v0 = vshrl.u32 %v6184_v39, 16  ;;  %v3058_v30 = vshll.u32 %v6184_v39, 16  ;;  %v917_v15 = vadd.f32 %v916_v46, %v6185_v57  ;;  %v3044_v46 = vsel %vm2919_vm8, %v3034_v16, %v3043_v44  ;;  %v6189_v57 = vld [vmem:[#allocation14_spill] sm:$0xff] }
 0x134   : > { %v5714_v54 = vadd.f32 %v1178_v1, %v901_v37  ;;  %v4343_v20 = vpop.f32.mrf.mxu1  ;;  %4558 = vmatmul.mubr.msk.bf16.gmra.mxu1 %vm505_vm3, %v3017_v60  ;;  %v3389_v1 = vsel %vm3366_vm7, %v3386_v38, %v3388_v25  ;;  %v3051_v60 = vrot.slane %v3049_v7, 3  ;;  %v3067_v16 = vshll.u32 %v5553_v3, 16 }
 0x135   : > { %v4377_v53 = vpop.f32.mrf.mxu0  ;;  %4592 = vmatmul.mubr.msk.bf16.gmra.mxu0 %vm505_vm3, %v3383_v24  ;;  %4561 = vmatprep.mubr.msk.bf16.mxu1 %vm505_vm3, %v3026_v21  ;;  %v3057_v50 = vrot.slane %v3055_v0, 2  ;;  %v3060_v12 = vrot.slane %v3058_v30, 3 }
 0x136   : > { %v5720_v35 = vadd.f32 %v4377_v53, %v922_v27  ;;  %4595 = vmatprep.mubr.msk.bf16.mxu0 %vm505_vm3, %v3385_v5  ;;  %v929_v52 = vpop.f32.mrf.mxu1  ;;  %v6186_v5 = vld [vmem:[#allocation4_spill] sm:$0xff]  ;;  %v3048_v27 = vrot.slane %v3046_v9, 2  ;;  %v6188_v9 = vld [vmem:[#allocation6_spill] sm:$0xff] }
 0x137   : > { %v1191_v51 = vpop.f32.mrf.mxu0  ;;  %v938_v26 = vadd.f32 %v4343_v20, %v6186_v5  ;;  %v3061_v30 = vor.u32 %v3060_v12, %v3057_v50 }
 0x138   : > { %v5727_v33 = vadd.f32 %v1191_v51, %v914_v6  ;;  %v4344_v37 = vpop.f32.mrf.mxu1  ;;  %v930_v6 = vadd.f32 %v929_v52, %v6187_v48  ;;  %v3052_v52 = vor.u32 %v3051_v60, %v3048_v27  ;;  %v5766_v27 = vld [vmem:[%s4793_s25 + $0xa0] ss:$0 sps:$4 sm:$0x77]   ;;  %v6191_v60 = vld [vmem:[#allocation8_spill] sm:$0xff] }
 0x139   : > { %v4378_v18 = vpop.f32.mrf.mxu0  ;;  %v941_v7 = vadd.f32 %v4344_v37, %v6188_v9 }
 0x13a   : > { %v5735_v43 = vadd.f32 %v4378_v18, %v925_v22  ;;  %v932_v53 = vpop.f32.mrf.mxu1  ;;  %v3064_v22 = vshrl.u32 %v5553_v3, 16  ;;  %v3053_v48 = vsel %vm2919_vm8, %v3043_v44, %v3052_v52 }
 0x13b   : > { %v1194_v24 = vpop.f32.mrf.mxu0 }
 0x13c   : > { %v5741_v45 = vadd.f32 %v1194_v24, %v917_v15  ;;  %v4347_v38 = vpop.f32.mrf.mxu1  ;;  %4562 = vmatmul.mubr.msk.bf16.gmra.mxu1 %vm505_vm3, %v3035_v55  ;;  %v3073_v15 = vshrl.u32 %v6189_v57, 16  ;;  %v933_v24 = vadd.f32 %v932_v53, %v6190_v8  ;;  %v3396_v8 = vrot.slane %v6184_v39, 3 }
 0x13d   : > { %v4381_v21 = vpop.f32.mrf.mxu0  ;;  %4596 = vmatmul.mubr.msk.bf16.gmra.mxu0 %vm505_vm3, %v3387_v36  ;;  %4565 = vmatprep.mubr.msk.bf16.mxu1 %vm505_vm3, %v3044_v46  ;;  %v3076_v36 = vshll.u32 %v6189_v57, 16  ;;  %v3069_v46 = vrot.slane %v3067_v16, 3  ;;  %v954_v50 = vadd.f32 %v4347_v38, %v6191_v60  ;;  %v3394_v38 = vrot.slane %v6183_v14, 3 }
 0x13e   : > { %v5746_v51 = vadd.f32 %v4381_v21, %v938_v26  ;;  %4599 = vmatprep.mubr.msk.bf16.mxu0 %vm505_vm3, %v3389_v1  ;;  %v945_v0 = vpop.f32.mrf.mxu1  ;;  %v3391_v1 = vsel %vm3366_vm7, %v3388_v25, %v3390_v47  ;;  %v3393_v26 = vsel %vm3366_vm7, %v3390_v47, %v3392_v17  ;;  %v3066_v21 = vrot.slane %v3064_v22, 2 }
 0x13f   : > { %v1207_v20 = vpop.f32.mrf.mxu0  ;;  %v3062_v25 = vsel %vm2919_vm8, %v3052_v52, %v3061_v30  ;;  %v3078_v9 = vrot.slane %v3076_v36, 3  ;;  %v6193_v52 = vld [vmem:[#allocation11_spill] sm:$0xff] }
 0x140   : > { %v5755_v18 = vadd.f32 %v1207_v20, %v930_v6  ;;  %v4348_v37 = vpop.f32.mrf.mxu1  ;;  %v3075_v20 = vrot.slane %v3073_v15, 2  ;;  %v6194_v36 = vld [vmem:[#allocation15_spill] sm:$0xff] }
 0x141   : > { %v4382_v63 = vpop.f32.mrf.mxu0  ;;  %v957_v15 = vadd.f32 %v4348_v37, %v6193_v52 }
 0x142   : > { %v5761_v55 = vadd.f32 %v4382_v63, %v941_v7  ;;  %v948_v6 = vpop.f32.mrf.mxu1  ;;  %v6192_v7 = vld [vmem:[#allocation9_spill] sm:$0xff]  ;;  %v3070_v63 = vor.u32 %v3069_v46, %v3066_v21  ;;  %v3079_v60 = vor.u32 %v3078_v9, %v3075_v20  ;;  %v6196_v21 = vld [vmem:[#allocation16_spill] sm:$0xff] }
 0x143   : > { %v1210_v5 = vpop.f32.mrf.mxu0  ;;  %v946_v47 = vadd.f32 %v945_v0, %v6192_v7 }
 0x144   : > { %v5769_v12 = vadd.f32 %v1210_v5, %v933_v24  ;;  %v4391_v16 = vpop.f32.mrf.mxu1  ;;  %4566 = vmatmul.mubr.msk.bf16.gmra.mxu1 %vm505_vm3, %v3053_v48  ;;  %v3082_v24 = vshrl.u32 %v5766_v27, 16  ;;  %v3085_v5 = vshll.u32 %v5766_v27, 16 }
 0x145   : > { %v4385_v53 = vpop.f32.mrf.mxu0  ;;  %4600 = vmatmul.mubr.msk.bf16.gmra.mxu0 %vm505_vm3, %v3391_v1  ;;  %v1679_v1 = vadd.f32 %v4391_v16, %v6194_v36  ;;  %4569 = vmatprep.mubr.msk.bf16.mxu1 %vm505_vm3, %v3062_v25  ;;  %v3397_v16 = vsel %vm3366_vm7, %v3394_v38, %v3396_v8 }
 0x146   : > { %v5775_v22 = vadd.f32 %v4385_v53, %v954_v50  ;;  %4603 = vmatprep.mubr.msk.bf16.mxu0 %vm505_vm3, %v3393_v26  ;;  %v1534_v14 = vpop.f32.mrf.mxu1  ;;  %v6195_v50 = vld [vmem:[#allocation13_spill] sm:$0xff]  ;;  %v3395_v53 = vsel %vm3366_vm7, %v3392_v17, %v3394_v38  ;;  %v3084_v52 = vrot.slane %v3082_v24, 2  ;;  %v3087_v20 = vrot.slane %v3085_v5, 3 }
 0x147   : > { %v1223_v44 = vpop.f32.mrf.mxu0  ;;  %v949_v48 = vadd.f32 %v948_v6, %v6195_v50  ;;  %v1677_v46 = vadd.f32 %v1534_v14, %v6196_v21  ;;  %v3400_v24 = vrot.slane %v6189_v57, 3 }
 0x148   : > { %v5784_v0 = vadd.f32 %v1223_v44, %v946_v47  ;;  %v4392_v37 = vpop.f32.mrf.mxu1  ;;  %v3071_v47 = vsel %vm2919_vm8, %v3061_v30, %v3070_v63  ;;  %v3398_v30 = vrot.slane %v5553_v3, 3 }
 0x149   : > { %v4386_v26 = vpop.f32.mrf.mxu0  ;;  %v1680_v25 = vadd.f32 %v4392_v37, %v5581_v28 }
 0x14a   : > { %v5790_v39 = vadd.f32 %v4386_v26, %v957_v15  ;;  %v1537_v9 = vpop.f32.mrf.mxu1  ;;  %v3080_v15 = vsel %vm2919_vm8, %v3070_v63, %v3079_v60  ;;  %v3088_v63 = vor.u32 %v3087_v20, %v3084_v52  ;;  %v3399_v3 = vsel %vm3366_vm7, %v3396_v8, %v3398_v30 }
 0x14b   : > { %v1226_v7 = vpop.f32.mrf.mxu0  ;;  %v1678_v17 = vadd.f32 %v1537_v9, %v5587_v32  ;;  %v3402_v8 = vrot.slane %v5766_v27, 3 }
 0x14c   : > { %v5796_v44 = vadd.f32 %v1226_v7, %v949_v48  ;;  %v4395_v38 = vpop.f32.mrf.mxu1  ;;  %4570 = vmatmul.mubr.msk.bf16.gmra.mxu1 %vm505_vm3, %v3071_v47 }
 0x14d   : > { %v4429_v6 = vpop.f32.mrf.mxu0  ;;  %4604 = vmatmul.mubr.msk.bf16.gmra.mxu0 %vm505_vm3, %v3395_v53  ;;  %v1683_v5 = vadd.f32 %v4395_v38, %v5592_v34  ;;  %4573 = vmatprep.mubr.msk.bf16.mxu1 %vm505_vm3, %v3080_v15  ;;  %v3401_v53 = vsel %vm3366_vm7, %v3398_v30, %v3400_v24 }
 0x14e   : > { %v5801_v36 = vadd.f32 %v4429_v6, %v1679_v1  ;;  %4607 = vmatprep.mubr.msk.bf16.mxu0 %vm505_vm3, %v3397_v16  ;;  %v1550_v32 = vpop.f32.mrf.mxu1 }
 0x14f   : > { %v1981_v28 = vpop.f32.mrf.mxu0  ;;  %v1681_v26 = vadd.f32 %v1550_v32, %v5600_v10 }
 0x150   : > { %v5808_v14 = vadd.f32 %v1981_v28, %v1677_v46  ;;  %v4396_v48 = vpop.f32.mrf.mxu1  ;;  %v3089_v46 = vsel %vm2919_vm8, %v3079_v60, %v3088_v63 }
 0x151   : > { %v4430_v1 = vpop.f32.mrf.mxu0  ;;  %v1684_v57 = vadd.f32 %v4396_v48, %v5606_v41 }
 0x152   : > { %v5812_v50 = vadd.f32 %v4430_v1, %v1680_v25  ;;  %v1553_v37 = vpop.f32.mrf.mxu1 }
 0x153   : > { %v1984_v21 = vpop.f32.mrf.mxu0  ;;  %v1682_v10 = vadd.f32 %v1553_v37, %v5610_v11  ;;  %v3403_v11 = vsel %vm3366_vm7, %v3400_v24, %v3402_v8 }
 0x154   : > { %v5817_v34 = vadd.f32 %v1984_v21, %v1678_v17  ;;  %v4399_v16 = vpop.f32.mrf.mxu1  ;;  %4574 = vmatmul.mubr.msk.bf16.gmra.mxu1 %vm505_vm3, %v3089_v46 }
 0x155   : > { %v4433_v7 = vpop.f32.mrf.mxu0  ;;  %4608 = vmatmul.mubr.msk.bf16.gmra.mxu0 %vm505_vm3, %v3399_v3  ;;  %v1687_v25 = vadd.f32 %v4399_v16, %v5616_v19 }
 0x156   : > { %v5822_v47 = vadd.f32 %v4433_v7, %v1683_v5  ;;  %4611 = vmatprep.mubr.msk.bf16.mxu0 %vm505_vm3, %v3401_v53  ;;  %v1566_v60 = vpop.f32.mrf.mxu1 }
 0x157   : > { %v1997_v41 = vpop.f32.mrf.mxu0  ;;  %v1685_v9 = vadd.f32 %v1566_v60, %v5623_v40 }
 0x158   : > { %v5828_v52 = vadd.f32 %v1997_v41, %v1681_v26  ;;  %v4400_v15 = vpop.f32.mrf.mxu1 }
 0x159   : > { %v4434_v20 = vpop.f32.mrf.mxu0  ;;  %v1688_v27 = vadd.f32 %v4400_v15, %v5631_v13 }
 0x15a   : > { %v5831_v6 = vadd.f32 %v4434_v20, %v1684_v57  ;;  %v1569_v38 = vpop.f32.mrf.mxu1 }
 0x15b   : > { %v2000_v17 = vpop.f32.mrf.mxu0  ;;  %v1686_v19 = vadd.f32 %v1569_v38, %v5638_v23 }
 0x15c   : > { %v5835_v30 = vadd.f32 %v2000_v17, %v1682_v10  ;;  %v4403_v63 = vpop.f32.mrf.mxu1 }
 0x15d   : > { %v4437_v28 = vpop.f32.mrf.mxu0  ;;  %4612 = vmatmul.mubr.msk.bf16.gmra.mxu0 %vm505_vm3, %v3403_v11  ;;  %v1691_v32 = vadd.f32 %v4403_v63, %v5644_v4 }
 0x15e   : > { %v5839_v5 = vadd.f32 %v4437_v28, %v1687_v25  ;;  %v1582_v24 = vpop.f32.mrf.mxu1 }
 0x15f   : > { %v2013_v40 = vpop.f32.mrf.mxu0  ;;  %v1689_v13 = vadd.f32 %v1582_v24, %v5653_v62 }
 0x160   : > { %v5842_v1 = vadd.f32 %v2013_v40, %v1685_v9  ;;  %v4404_v48 = vpop.f32.mrf.mxu1 }
 0x161   : > { %v4438_v26 = vpop.f32.mrf.mxu0  ;;  %v1692_v53 = vadd.f32 %v4404_v48, %v5659_v2 }
 0x162   : > { %v5845_v3 = vadd.f32 %v4438_v26, %v1688_v27  ;;  %v1585_v23 = vpop.f32.mrf.mxu1 }
 0x163   : > { %v2016_v21 = vpop.f32.mrf.mxu0  ;;  %v1690_v37 = vadd.f32 %v1585_v23, %v5664_v42 }
 0x164   : > { %v5848_v57 = vadd.f32 %v2016_v21, %v1686_v19  ;;  %v4407_v4 = vpop.f32.mrf.mxu1 }
 0x165   : > { %v4441_v46 = vpop.f32.mrf.mxu0  ;;  %v1695_v8 = vadd.f32 %v4407_v4, %v5670_v29 }
 0x166   : > { %v5851_v7 = vadd.f32 %v4441_v46, %v1691_v32  ;;  %v1598_v62 = vpop.f32.mrf.mxu1 }
 0x167   : > { %v2029_v10 = vpop.f32.mrf.mxu0  ;;  %v1693_v25 = vadd.f32 %v1598_v62, %v5676_v61 }
 0x168   : > { %v5854_v16 = vadd.f32 %v2029_v10, %v1689_v13  ;;  %v4408_v2 = vpop.f32.mrf.mxu1 }
 0x169   : > { %v4442_v41 = vpop.f32.mrf.mxu0  ;;  %v1696_v9 = vadd.f32 %v4408_v2, %v5683_v49 }
 0x16a   : > { %v5857_v60 = vadd.f32 %v4442_v41, %v1692_v53  ;;  %v1601_v42 = vpop.f32.mrf.mxu1 }
 0x16b   : > { %v2032_v20 = vpop.f32.mrf.mxu0  ;;  %v1694_v17 = vadd.f32 %v1601_v42, %v5689_v56 }
 0x16c   : > { %v5860_v11 = vadd.f32 %v2032_v20, %v1690_v37  ;;  %v4411_v29 = vpop.f32.mrf.mxu1 }
 0x16d   : > { %v4445_v15 = vpop.f32.mrf.mxu0  ;;  %v1699_v28 = vadd.f32 %v4411_v29, %v5694_v31 }
 0x16e   : > { %v5863_v27 = vadd.f32 %v4445_v15, %v1695_v8  ;;  %v1614_v61 = vpop.f32.mrf.mxu1 }
 0x16f   : > { %v2045_v38 = vpop.f32.mrf.mxu0  ;;  %v1697_v40 = vadd.f32 %v1614_v61, %v5703_v58 }
 0x170   : > { %v5866_v19 = vadd.f32 %v2045_v38, %v1693_v25  ;;  %v4412_v49 = vpop.f32.mrf.mxu1 }
 0x171   : > { %v4446_v63 = vpop.f32.mrf.mxu0  ;;  %v1700_v26 = vadd.f32 %v4412_v49, %v5709_v59 }
 0x172   : > { %v5869_v32 = vadd.f32 %v4446_v63, %v1696_v9  ;;  %v1617_v56 = vpop.f32.mrf.mxu1 }
 0x173   : > { %v2048_v24 = vpop.f32.mrf.mxu0  ;;  %v1698_v21 = vadd.f32 %v1617_v56, %v5714_v54 }
 0x174   : > { %v5872_v13 = vadd.f32 %v2048_v24, %v1694_v17  ;;  %v4415_v31 = vpop.f32.mrf.mxu1 }
 0x175   : > { %v4449_v48 = vpop.f32.mrf.mxu0  ;;  %v1703_v46 = vadd.f32 %v4415_v31, %v5720_v35 }
 0x176   : > { %v5875_v53 = vadd.f32 %v4449_v48, %v1699_v28  ;;  %v1630_v58 = vpop.f32.mrf.mxu1 }
 0x177   : > { %v2061_v23 = vpop.f32.mrf.mxu0  ;;  %v1701_v10 = vadd.f32 %v1630_v58, %v5727_v33 }
 0x178   : > { %v5878_v37 = vadd.f32 %v2061_v23, %v1697_v40  ;;  %v4416_v59 = vpop.f32.mrf.mxu1 }
 0x179   : > { %v4450_v4 = vpop.f32.mrf.mxu0  ;;  %v1704_v41 = vadd.f32 %v4416_v59, %v5735_v43 }
 0x17a   : > { %v5881_v8 = vadd.f32 %v4450_v4, %v1700_v26  ;;  %v1633_v54 = vpop.f32.mrf.mxu1 }
 0x17b   : > { %v2064_v62 = vpop.f32.mrf.mxu0  ;;  %v1702_v20 = vadd.f32 %v1633_v54, %v5741_v45 }
 0x17c   : > { %v5884_v25 = vadd.f32 %v2064_v62, %v1698_v21  ;;  %v4419_v35 = vpop.f32.mrf.mxu1 }
 0x17d   : > { %v4453_v2 = vpop.f32.mrf.mxu0  ;;  %v1707_v15 = vadd.f32 %v4419_v35, %v5746_v51 }
 0x17e   : > { %v5887_v9 = vadd.f32 %v4453_v2, %v1703_v46  ;;  %v1646_v33 = vpop.f32.mrf.mxu1 }
 0x17f   : > { %v2077_v42 = vpop.f32.mrf.mxu0  ;;  %v1705_v38 = vadd.f32 %v1646_v33, %v5755_v18 }
 0x180   : > { %v5890_v17 = vadd.f32 %v2077_v42, %v1701_v10  ;;  %v4420_v43 = vpop.f32.mrf.mxu1 }
 0x181   : > { %v4454_v29 = vpop.f32.mrf.mxu0  ;;  %v1708_v63 = vadd.f32 %v4420_v43, %v5761_v55 }
 0x182   : > { %v5893_v28 = vadd.f32 %v4454_v29, %v1704_v41  ;;  %v1649_v45 = vpop.f32.mrf.mxu1 }
 0x183   : > { %v2080_v61 = vpop.f32.mrf.mxu0  ;;  %v1706_v24 = vadd.f32 %v1649_v45, %v5769_v12 }
 0x184   : > { %v5896_v40 = vadd.f32 %v2080_v61, %v1702_v20  ;;  %v4423_v51 = vpop.f32.mrf.mxu1 }
 0x185   : > { %v4457_v49 = vpop.f32.mrf.mxu0  ;;  %v1711_v48 = vadd.f32 %v4423_v51, %v5775_v22 }
 0x186   : > { %v5899_v26 = vadd.f32 %v4457_v49, %v1707_v15  ;;  %v1662_v18 = vpop.f32.mrf.mxu1 }
 0x187   : > { %v2093_v56 = vpop.f32.mrf.mxu0  ;;  %v1709_v23 = vadd.f32 %v1662_v18, %v5784_v0 }
 0x188   : > { %v5902_v21 = vadd.f32 %v2093_v56, %v1705_v38  ;;  %v4424_v55 = vpop.f32.mrf.mxu1 }
 0x189   : > { %v4458_v31 = vpop.f32.mrf.mxu0  ;;  %v1712_v4 = vadd.f32 %v4424_v55, %v5790_v39 }
 0x18a   : > { %v5905_v46 = vadd.f32 %v4458_v31, %v1708_v63  ;;  %v1665_v12 = vpop.f32.mrf.mxu1 }
 0x18b   : > { %v2096_v58 = vpop.f32.mrf.mxu0  ;;  %v1710_v62 = vadd.f32 %v1665_v12, %v5796_v44 }
 0x18c   : > { %v5908_v10 = vadd.f32 %v2096_v58, %v1706_v24  ;;  %v4467_v22 = vpop.f32.mrf.mxu1 }
 0x18d   : > { %v4461_v59 = vpop.f32.mrf.mxu0  ;;  %v2440_v2 = vadd.f32 %v4467_v22, %v5801_v36 }
 0x18e   : > { %v5911_v41 = vadd.f32 %v4461_v59, %v1711_v48  ;;  %v2295_v0 = vpop.f32.mrf.mxu1 }
 0x18f   : > { %v2109_v54 = vpop.f32.mrf.mxu0  ;;  %v2438_v42 = vadd.f32 %v2295_v0, %v5808_v14 }
 0x190   : > { %v5914_v20 = vadd.f32 %v2109_v54, %v1709_v23  ;;  %v4468_v39 = vpop.f32.mrf.mxu1 }
 0x191   : > { %v4462_v35 = vpop.f32.mrf.mxu0  ;;  %v2441_v29 = vadd.f32 %v4468_v39, %v5812_v50 }
 0x192   : > { %v5917_v15 = vadd.f32 %v4462_v35, %v1712_v4  ;;  %v2298_v44 = vpop.f32.mrf.mxu1 }
 0x193   : > { %v2112_v33 = vpop.f32.mrf.mxu0  ;;  %v2439_v61 = vadd.f32 %v2298_v44, %v5817_v34 }
 0x194   : > { %v5920_v38 = vadd.f32 %v2112_v33, %v1710_v62  ;;  %v4471_v36 = vpop.f32.mrf.mxu1 }
 0x195   : > { %v4505_v43 = vpop.f32.mrf.mxu0  ;;  %v2444_v49 = vadd.f32 %v4471_v36, %v5822_v47 }
 0x196   : > { %v5923_v63 = vadd.f32 %v4505_v43, %v2440_v2  ;;  %v2311_v14 = vpop.f32.mrf.mxu1 }
 0x197   : > { %v2734_v45 = vpop.f32.mrf.mxu0  ;;  %v2442_v56 = vadd.f32 %v2311_v14, %v5828_v52 }
 0x198   : > { %v5926_v24 = vadd.f32 %v2734_v45, %v2438_v42  ;;  %v4472_v50 = vpop.f32.mrf.mxu1 }
 0x199   : > { %v4506_v51 = vpop.f32.mrf.mxu0  ;;  %v2445_v31 = vadd.f32 %v4472_v50, %v5831_v6 }
 0x19a   : > { %v5929_v48 = vadd.f32 %v4506_v51, %v2441_v29  ;;  %v2314_v34 = vpop.f32.mrf.mxu1 }
 0x19b   : > { %v2737_v18 = vpop.f32.mrf.mxu0  ;;  %v2443_v58 = vadd.f32 %v2314_v34, %v5835_v30 }
 0x19c   : > { %v5932_v23 = vadd.f32 %v2737_v18, %v2439_v61  ;;  %v4475_v47 = vpop.f32.mrf.mxu1 }
 0x19d   : > { %v4509_v55 = vpop.f32.mrf.mxu0  ;;  %v2448_v59 = vadd.f32 %v4475_v47, %v5839_v5 }
 0x19e   : > { %v5935_v4 = vadd.f32 %v4509_v55, %v2444_v49  ;;  %v2327_v52 = vpop.f32.mrf.mxu1 }
 0x19f   : > { %v2750_v12 = vpop.f32.mrf.mxu0  ;;  %v2446_v54 = vadd.f32 %v2327_v52, %v5842_v1 }
 0x1a0   : > { %v5938_v62 = vadd.f32 %v2750_v12, %v2442_v56  ;;  %v4476_v6 = vpop.f32.mrf.mxu1 }
 0x1a1   : > { %v4510_v22 = vpop.f32.mrf.mxu0  ;;  %v2449_v35 = vadd.f32 %v4476_v6, %v5845_v3 }
 0x1a2   : > { %v5941_v2 = vadd.f32 %v4510_v22, %v2445_v31  ;;  %v2330_v30 = vpop.f32.mrf.mxu1 }
 0x1a3   : > { %v2753_v0 = vpop.f32.mrf.mxu0  ;;  %v2447_v33 = vadd.f32 %v2330_v30, %v5848_v57 }
 0x1a4   : > { %v5944_v42 = vadd.f32 %v2753_v0, %v2443_v58  ;;  %v4479_v5 = vpop.f32.mrf.mxu1 }
 0x1a5   : > { %v4513_v39 = vpop.f32.mrf.mxu0  ;;  %v2452_v43 = vadd.f32 %v4479_v5, %v5851_v7 }
 0x1a6   : > { %v5947_v29 = vadd.f32 %v4513_v39, %v2448_v59  ;;  %v2343_v1 = vpop.f32.mrf.mxu1 }
 0x1a7   : > { %v2766_v44 = vpop.f32.mrf.mxu0  ;;  %v2450_v45 = vadd.f32 %v2343_v1, %v5854_v16 }
 0x1a8   : > { %v5950_v61 = vadd.f32 %v2766_v44, %v2446_v54  ;;  %v4480_v3 = vpop.f32.mrf.mxu1 }
 0x1a9   : > { %v4514_v36 = vpop.f32.mrf.mxu0  ;;  %v2453_v51 = vadd.f32 %v4480_v3, %v5857_v60 }
 0x1aa   : > { %v5953_v49 = vadd.f32 %v4514_v36, %v2449_v35  ;;  %v2346_v57 = vpop.f32.mrf.mxu1 }
 0x1ab   : > { %v2769_v14 = vpop.f32.mrf.mxu0  ;;  %v2451_v18 = vadd.f32 %v2346_v57, %v5860_v11 }
 0x1ac   : > { %v5956_v56 = vadd.f32 %v2769_v14, %v2447_v33  ;;  %v4483_v7 = vpop.f32.mrf.mxu1 }
 0x1ad   : > { %v4517_v50 = vpop.f32.mrf.mxu0  ;;  %v2456_v55 = vadd.f32 %v4483_v7, %v5863_v27 }
 0x1ae   : > { %v5959_v31 = vadd.f32 %v4517_v50, %v2452_v43  ;;  %v2359_v16 = vpop.f32.mrf.mxu1 }
 0x1af   : > { %v2782_v34 = vpop.f32.mrf.mxu0  ;;  %v2454_v12 = vadd.f32 %v2359_v16, %v5866_v19 }
 0x1b0   : > { %v5962_v58 = vadd.f32 %v2782_v34, %v2450_v45  ;;  %v4484_v60 = vpop.f32.mrf.mxu1 }
 0x1b1   : > { %v4518_v47 = vpop.f32.mrf.mxu0  ;;  %v2457_v22 = vadd.f32 %v4484_v60, %v5869_v32 }
 0x1b2   : > { %v5965_v59 = vadd.f32 %v4518_v47, %v2453_v51  ;;  %v2362_v11 = vpop.f32.mrf.mxu1 }
 0x1b3   : > { %v2785_v52 = vpop.f32.mrf.mxu0  ;;  %v2455_v0 = vadd.f32 %v2362_v11, %v5872_v13 }
 0x1b4   : > { %v5968_v54 = vadd.f32 %v2785_v52, %v2451_v18  ;;  %v4487_v27 = vpop.f32.mrf.mxu1 }
 0x1b5   : > { %v4521_v6 = vpop.f32.mrf.mxu0  ;;  %v2460_v39 = vadd.f32 %v4487_v27, %v5875_v53 }
 0x1b6   : > { %v5971_v35 = vadd.f32 %v4521_v6, %v2456_v55  ;;  %v2375_v19 = vpop.f32.mrf.mxu1 }
 0x1b7   : > { %v2798_v30 = vpop.f32.mrf.mxu0  ;;  %v2458_v44 = vadd.f32 %v2375_v19, %v5878_v37 }
 0x1b8   : > { %v5974_v33 = vadd.f32 %v2798_v30, %v2454_v12  ;;  %v4488_v32 = vpop.f32.mrf.mxu1 }
 0x1b9   : > { %v4522_v5 = vpop.f32.mrf.mxu0  ;;  %v2461_v36 = vadd.f32 %v4488_v32, %v5881_v8 }
 0x1ba   : > { %v5977_v43 = vadd.f32 %v4522_v5, %v2457_v22  ;;  %v2378_v13 = vpop.f32.mrf.mxu1 }
 0x1bb   : > { %v2801_v1 = vpop.f32.mrf.mxu0  ;;  %v2459_v14 = vadd.f32 %v2378_v13, %v5884_v25 }
 0x1bc   : > { %v5980_v45 = vadd.f32 %v2801_v1, %v2455_v0  ;;  %v4491_v53 = vpop.f32.mrf.mxu1 }
 0x1bd   : > { %v4525_v3 = vpop.f32.mrf.mxu0  ;;  %v2464_v50 = vadd.f32 %v4491_v53, %v5887_v9 }
 0x1be   : > { %v5983_v51 = vadd.f32 %v4525_v3, %v2460_v39  ;;  %v2391_v37 = vpop.f32.mrf.mxu1 }
 0x1bf   : > { %v2814_v57 = vpop.f32.mrf.mxu0  ;;  %v2462_v34 = vadd.f32 %v2391_v37, %v5890_v17 }
 0x1c0   : > { %v5986_v18 = vadd.f32 %v2814_v57, %v2458_v44  ;;  %v4492_v8 = vpop.f32.mrf.mxu1 }
 0x1c1   : > { %v4526_v7 = vpop.f32.mrf.mxu0  ;;  %v2465_v47 = vadd.f32 %v4492_v8, %v5893_v28 }
 0x1c2   : > { %v5989_v55 = vadd.f32 %v4526_v7, %v2461_v36  ;;  %v2394_v25 = vpop.f32.mrf.mxu1 }
 0x1c3   : > { %v2817_v16 = vpop.f32.mrf.mxu0  ;;  %v2463_v52 = vadd.f32 %v2394_v25, %v5896_v40 }
 0x1c4   : > { %v5992_v12 = vadd.f32 %v2817_v16, %v2459_v14  ;;  %v4495_v9 = vpop.f32.mrf.mxu1 }
 0x1c5   : > { %v4529_v60 = vpop.f32.mrf.mxu0  ;;  %v2468_v6 = vadd.f32 %v4495_v9, %v5899_v26 }
 0x1c6   : > { %v5995_v22 = vadd.f32 %v4529_v60, %v2464_v50  ;;  %v2407_v17 = vpop.f32.mrf.mxu1 }
 0x1c7   : > { %v2830_v11 = vpop.f32.mrf.mxu0  ;;  %v2466_v30 = vadd.f32 %v2407_v17, %v5902_v21 }
 0x1c8   : > { %v5998_v0 = vadd.f32 %v2830_v11, %v2462_v34  ;;  %v4496_v28 = vpop.f32.mrf.mxu1 }
 0x1c9   : > { %v4530_v27 = vpop.f32.mrf.mxu0  ;;  %v2469_v5 = vadd.f32 %v4496_v28, %v5905_v46 }
 0x1ca   : > { %v6001_v39 = vadd.f32 %v4530_v27, %v2465_v47  ;;  %v2410_v40 = vpop.f32.mrf.mxu1 }
 0x1cb   : > { %v2833_v19 = vpop.f32.mrf.mxu0  ;;  %v2467_v1 = vadd.f32 %v2410_v40, %v5908_v10 }
 0x1cc   : > { %v6004_v44 = vadd.f32 %v2833_v19, %v2463_v52  ;;  %v4499_v26 = vpop.f32.mrf.mxu1 }
 0x1cd   : > { %v4533_v32 = vpop.f32.mrf.mxu0  ;;  %v2472_v3 = vadd.f32 %v4499_v26, %v5911_v41 }
 0x1ce   : > { %v6007_v36 = vadd.f32 %v4533_v32, %v2468_v6  ;;  %v2423_v21 = vpop.f32.mrf.mxu1 }
 0x1cf   : > { %v2846_v13 = vpop.f32.mrf.mxu0  ;;  %v2470_v57 = vadd.f32 %v2423_v21, %v5914_v20 }
 0x1d0   : > { %v6010_v14 = vadd.f32 %v2846_v13, %v2466_v30  ;;  %v4500_v46 = vpop.f32.mrf.mxu1 }
 0x1d1   : > { %v4534_v53 = vpop.f32.mrf.mxu0  ;;  %v2473_v7 = vadd.f32 %v4500_v46, %v5917_v15 }
 0x1d2   : > { %v6013_v50 = vadd.f32 %v4534_v53, %v2469_v5  ;;  %v2426_v34 = vpop.f32.mrf.mxu1 }
 0x1d3   : > { %v2849_v37 = vpop.f32.mrf.mxu0  ;;  %v2471_v16 = vadd.f32 %v2426_v34, %v5920_v38  ;;  %v6032_v38 = vld [vmem:[%s6157_s2] ss:$0 sm:$0xff] }
 0x1d4   : > { %v6016_v10 = vadd.f32 %v2849_v37, %v2467_v1  ;;  %v4543_v47 = vpop.f32.mrf.mxu1 }
 0x1d5   : > { %v4537_v8 = vpop.f32.mrf.mxu0  ;;  %v3326_v15 = vadd.f32 %v4543_v47, %v5923_v63 }
 0x1d6   : > { %v6019_v41 = vadd.f32 %v4537_v8, %v2472_v3  ;;  %v3181_v20 = vpop.f32.mrf.mxu1 }
 0x1d7   : > { %v2862_v25 = vpop.f32.mrf.mxu0  ;;  %v3324_v28 = vadd.f32 %v3181_v20, %v5926_v24 }
 0x1d8   : > { %v6021_v60 = vadd.f32 %v2862_v25, %v2470_v57  ;;  %v4544_v11 = vpop.f32.mrf.mxu1 }
 0x1d9   : > { %v4538_v52 = vpop.f32.mrf.mxu0  ;;  %v3327_v40 = vadd.f32 %v4544_v11, %v5929_v48 }
 0x1da   : > { %v6023_v9 = vadd.f32 %v4538_v52, %v2473_v7  ;;  %v3184_v27 = vpop.f32.mrf.mxu1 }
 0x1db   : > { %v2865_v6 = vpop.f32.mrf.mxu0  ;;  %v3325_v24 = vadd.f32 %v3184_v27, %v5932_v23 }
 0x1dc   : > { %v6027_v17 = vadd.f32 %v2865_v6, %v2471_v16  ;;  %v4547_v5 = vpop.f32.mrf.mxu1 }
 0x1dd   : > { %v4581_v30 = vpop.f32.mrf.mxu0  ;;  %v3330_v46 = vadd.f32 %v4547_v5, %v5935_v4 }
 0x1de   : > { %v3640_v19 = vadd.f32 %v4581_v30, %v3326_v15  ;;  %v3197_v26 = vpop.f32.mrf.mxu1 }
 0x1df   : > { %v3495_v63 = vpop.f32.mrf.mxu0  ;;  %v3328_v8 = vadd.f32 %v3197_v26, %v5938_v62 }
 0x1e0   : > { %v3683_v32 = vadd.f32 %v6032_v38, %v3640_v19  ;;  %v3638_v1 = vadd.f32 %v3495_v63, %v3324_v28  ;;  %v4548_v53 = vpop.f32.mrf.mxu1 }
 0x1e1   : > { %v4582_v13 = vpop.f32.mrf.mxu0  ;;  %v3331_v20 = vadd.f32 %v4548_v53, %v5941_v2 }
 0x1e2   : > { %3719 = vst [vmem:[%s6038_s20 + $0x10] sm:$0xff] %v3683_v32  ;;  %v3681_v3 = vadd.f32 %v6032_v38, %v3638_v1  ;;  %v3641_v21 = vadd.f32 %v4582_v13, %v3327_v40  ;;  %v3200_v7 = vpop.f32.mrf.mxu1 }
 0x1e3   : > { %v3498_v57 = vpop.f32.mrf.mxu0  ;;  %v3329_v15 = vadd.f32 %v3200_v7, %v5944_v42 }
 0x1e4   : > { %3717 = vst [vmem:[%s6038_s20] sm:$0xff] %v3681_v3  ;;  %v3684_v48 = vadd.f32 %v6032_v38, %v3641_v21  ;;  %v3639_v37 = vadd.f32 %v3498_v57, %v3325_v24  ;;  %v4551_v47 = vpop.f32.mrf.mxu1 }
 0x1e5   : > { %v4585_v34 = vpop.f32.mrf.mxu0  ;;  %v3334_v19 = vadd.f32 %v4551_v47, %v5947_v29 }
 0x1e6   : > { %3720 = vst [vmem:[%s6038_s20 + $0x18] sm:$0xff] %v3684_v48  ;;  %v3682_v23 = vadd.f32 %v6032_v38, %v3639_v37  ;;  %v3644_v16 = vadd.f32 %v4585_v34, %v3330_v46  ;;  %v3213_v11 = vpop.f32.mrf.mxu1 }
 0x1e7   : > { %v3511_v25 = vpop.f32.mrf.mxu0  ;;  %v3332_v32 = vadd.f32 %v3213_v11, %v5950_v61 }
 0x1e8   : > { %3718 = vst [vmem:[%s6038_s20 + $0x8] sm:$0xff] %v3682_v23  ;;  %v3687_v4 = vadd.f32 %v6032_v38, %v3644_v16  ;;  %v3642_v52 = vadd.f32 %v3511_v25, %v3328_v8  ;;  %v4552_v30 = vpop.f32.mrf.mxu1 }
 0x1e9   : > { %v4586_v6 = vpop.f32.mrf.mxu0  ;;  %v3335_v24 = vadd.f32 %v4552_v30, %v5953_v49 }
 0x1ea   : > { %3723 = vst [vmem:[%s6038_s20 + $0x30] sm:$0xff] %v3687_v4  ;;  %v3685_v62 = vadd.f32 %v6032_v38, %v3642_v52  ;;  %v3645_v27 = vadd.f32 %v4586_v6, %v3331_v20  ;;  %v3216_v63 = vpop.f32.mrf.mxu1 }
 0x1eb   : > { %v3514_v28 = vpop.f32.mrf.mxu0  ;;  %v3333_v57 = vadd.f32 %v3216_v63, %v5956_v56 }
 0x1ec   : > { %3721 = vst [vmem:[%s6038_s20 + $0x20] sm:$0xff] %v3685_v62  ;;  %v3688_v2 = vadd.f32 %v6032_v38, %v3645_v27  ;;  %v3643_v5 = vadd.f32 %v3514_v28, %v3329_v15  ;;  %v4555_v26 = vpop.f32.mrf.mxu1 }
 0x1ed   : > { %v4589_v40 = vpop.f32.mrf.mxu0  ;;  %v3338_v7 = vadd.f32 %v4555_v26, %v5959_v31 }
 0x1ee   : > { %3724 = vst [vmem:[%s6038_s20 + $0x38] sm:$0xff] %v3688_v2  ;;  %v3686_v42 = vadd.f32 %v6032_v38, %v3643_v5  ;;  %v3648_v1 = vadd.f32 %v4589_v40, %v3334_v19  ;;  %v3229_v21 = vpop.f32.mrf.mxu1 }
 0x1ef   : > { %v3527_v13 = vpop.f32.mrf.mxu0  ;;  %v3336_v16 = vadd.f32 %v3229_v21, %v5962_v58 }
 0x1f0   : > { %3722 = vst [vmem:[%s6038_s20 + $0x28] sm:$0xff] %v3686_v42  ;;  %v3691_v29 = vadd.f32 %v6032_v38, %v3648_v1  ;;  %v3646_v3 = vadd.f32 %v3527_v13, %v3332_v32  ;;  %v4556_v48 = vpop.f32.mrf.mxu1 }
 0x1f1   : > { %v4590_v53 = vpop.f32.mrf.mxu0  ;;  %v3339_v4 = vadd.f32 %v4556_v48, %v5965_v59 }
 0x1f2   : > { %3727 = vst [vmem:[%s6038_s20 + $0x50] sm:$0xff] %v3691_v29  ;;  %v3689_v61 = vadd.f32 %v6032_v38, %v3646_v3  ;;  %v3649_v46 = vadd.f32 %v4590_v53, %v3335_v24  ;;  %v3232_v8 = vpop.f32.mrf.mxu1 }
 0x1f3   : > { %v3530_v37 = vpop.f32.mrf.mxu0  ;;  %v3337_v15 = vadd.f32 %v3232_v8, %v5968_v54 }
 0x1f4   : > { %3725 = vst [vmem:[%s6038_s20 + $0x40] sm:$0xff] %v3689_v61  ;;  %v3692_v49 = vadd.f32 %v6032_v38, %v3649_v46  ;;  %v3647_v34 = vadd.f32 %v3530_v37, %v3333_v57  ;;  %v4559_v25 = vpop.f32.mrf.mxu1 }
 0x1f5   : > { %v4593_v23 = vpop.f32.mrf.mxu0  ;;  %v3342_v28 = vadd.f32 %v4559_v25, %v5971_v35 }
 0x1f6   : > { %3728 = vst [vmem:[%s6038_s20 + $0x58] sm:$0xff] %v3692_v49  ;;  %v3690_v56 = vadd.f32 %v6032_v38, %v3647_v34  ;;  %v3652_v47 = vadd.f32 %v4593_v23, %v3338_v7  ;;  %v3245_v11 = vpop.f32.mrf.mxu1 }
 0x1f7   : > { %v3543_v20 = vpop.f32.mrf.mxu0  ;;  %v3340_v63 = vadd.f32 %v3245_v11, %v5974_v33 }
 0x1f8   : > { %3726 = vst [vmem:[%s6038_s20 + $0x48] sm:$0xff] %v3690_v56  ;;  %v3695_v31 = vadd.f32 %v6032_v38, %v3652_v47  ;;  %v3650_v52 = vadd.f32 %v3543_v20, %v3336_v16  ;;  %v4560_v27 = vpop.f32.mrf.mxu1 }
 0x1f9   : > { %v4594_v6 = vpop.f32.mrf.mxu0  ;;  %v3343_v1 = vadd.f32 %v4560_v27, %v5977_v43 }
 0x1fa   : > { %3731 = vst [vmem:[%s6038_s20 + $0x70] sm:$0xff] %v3695_v31  ;;  %v3693_v58 = vadd.f32 %v6032_v38, %v3650_v52  ;;  %v3653_v62 = vadd.f32 %v4594_v6, %v3339_v4  ;;  %v3248_v2 = vpop.f32.mrf.mxu1 }
 0x1fb   : > { %v3546_v30 = vpop.f32.mrf.mxu0  ;;  %v3341_v29 = vadd.f32 %v3248_v2, %v5980_v45 }
 0x1fc   : > { %3729 = vst [vmem:[%s6038_s20 + $0x60] sm:$0xff] %v3693_v58  ;;  %v3696_v59 = vadd.f32 %v6032_v38, %v3653_v62  ;;  %v3651_v19 = vadd.f32 %v3546_v30, %v3337_v15  ;;  %v4563_v32 = vpop.f32.mrf.mxu1 }
 0x1fd   : > { %v4597_v5 = vpop.f32.mrf.mxu0  ;;  %v3346_v57 = vadd.f32 %v4563_v32, %v5983_v51 }
 0x1fe   : > { %3732 = vst [vmem:[%s6038_s20 + $0x78] sm:$0xff] %v3696_v59  ;;  %v3694_v54 = vadd.f32 %v6032_v38, %v3651_v19  ;;  %v3656_v40 = vadd.f32 %v4597_v5, %v3342_v28  ;;  %v3261_v13 = vpop.f32.mrf.mxu1 }
 0x1ff   : > { %v3559_v42 = vpop.f32.mrf.mxu0  ;;  %v3344_v37 = vadd.f32 %v3261_v13, %v5986_v18 }
 0x200   : > { %3730 = vst [vmem:[%s6038_s20 + $0x68] sm:$0xff] %v3694_v54  ;;  %v3699_v35 = vadd.f32 %v6032_v38, %v3656_v40  ;;  %v3654_v26 = vadd.f32 %v3559_v42, %v3340_v63  ;;  %v4564_v21 = vpop.f32.mrf.mxu1 }
 0x201   : > { %v4598_v24 = vpop.f32.mrf.mxu0  ;;  %v3347_v8 = vadd.f32 %v4564_v21, %v5989_v55 }
 0x202   : > { %3735 = vst [vmem:[%s6038_s20 + $0x90] sm:$0xff] %v3699_v35  ;;  %v3697_v33 = vadd.f32 %v6032_v38, %v3654_v26  ;;  %v3657_v3 = vadd.f32 %v4598_v24, %v3343_v1  ;;  %v3264_v46 = vpop.f32.mrf.mxu1 }
 0x203   : > { %v3562_v53 = vpop.f32.mrf.mxu0  ;;  %v3345_v47 = vadd.f32 %v3264_v46, %v5992_v12 }
 0x204   : > { %3733 = vst [vmem:[%s6038_s20 + $0x80] sm:$0xff] %v3697_v33  ;;  %v3700_v43 = vadd.f32 %v6032_v38, %v3657_v3  ;;  %v3655_v61 = vadd.f32 %v3562_v53, %v3341_v29  ;;  %v4567_v49 = vpop.f32.mrf.mxu1 }
 0x205   : > { %v4601_v48 = vpop.f32.mrf.mxu0  ;;  %v3350_v31 = vadd.f32 %v4567_v49, %v5995_v22 }
 0x206   : > { %3736 = vst [vmem:[%s6038_s20 + $0x98] sm:$0xff] %v3700_v43  ;;  %v3698_v45 = vadd.f32 %v6032_v38, %v3655_v61  ;;  %v3660_v7 = vadd.f32 %v4601_v48, %v3346_v57  ;;  %v3277_v16 = vpop.f32.mrf.mxu1 }
 0x207   : > { %v3575_v34 = vpop.f32.mrf.mxu0  ;;  %v3348_v15 = vadd.f32 %v3277_v16, %v5998_v0 }
 0x208   : > { %3734 = vst [vmem:[%s6038_s20 + $0x88] sm:$0xff] %v3698_v45  ;;  %v3703_v51 = vadd.f32 %v6032_v38, %v3660_v7  ;;  %v3658_v23 = vadd.f32 %v3575_v34, %v3344_v37  ;;  %v4568_v20 = vpop.f32.mrf.mxu1 }
 0x209   : > { %v4602_v56 = vpop.f32.mrf.mxu0  ;;  %v3351_v30 = vadd.f32 %v4568_v20, %v6001_v39 }
 0x20a   : > { %3739 = vst [vmem:[%s6038_s20 + $0xb0] sm:$0xff] %v3703_v51  ;;  %v3701_v18 = vadd.f32 %v6032_v38, %v3658_v23  ;;  %v3661_v25 = vadd.f32 %v4602_v56, %v3347_v8  ;;  %v3280_v11 = vpop.f32.mrf.mxu1 }
 0x20b   : > { %v3578_v4 = vpop.f32.mrf.mxu0  ;;  %v3349_v2 = vadd.f32 %v3280_v11, %v6004_v44 }
 0x20c   : > { %3737 = vst [vmem:[%s6038_s20 + $0xa0] sm:$0xff] %v3701_v18  ;;  %v3704_v55 = vadd.f32 %v6032_v38, %v3661_v25  ;;  %v3659_v52 = vadd.f32 %v3578_v4, %v3345_v47  ;;  %v4571_v62 = vpop.f32.mrf.mxu1 }
 0x20d   : > { %v4605_v6 = vpop.f32.mrf.mxu0  ;;  %v3354_v40 = vadd.f32 %v4571_v62, %v6007_v36 }
 0x20e   : > { %3740 = vst [vmem:[%s6038_s20 + $0xb8] sm:$0xff] %v3704_v55  ;;  %v3702_v12 = vadd.f32 %v6032_v38, %v3659_v52  ;;  %v3664_v58 = vadd.f32 %v4605_v6, %v3350_v31  ;;  %v3293_v59 = vpop.f32.mrf.mxu1 }
 0x20f   : > { %v3591_v27 = vpop.f32.mrf.mxu0  ;;  %v3352_v35 = vadd.f32 %v3293_v59, %v6010_v14 }
 0x210   : > { %3738 = vst [vmem:[%s6038_s20 + $0xa8] sm:$0xff] %v3702_v12  ;;  %v3707_v22 = vadd.f32 %v6032_v38, %v3664_v58  ;;  %v3662_v28 = vadd.f32 %v3591_v27, %v3348_v15  ;;  %v4572_v63 = vpop.f32.mrf.mxu1 }
 0x211   : > { %v4606_v19 = vpop.f32.mrf.mxu0  ;;  %v3355_v29 = vadd.f32 %v4572_v63, %v6013_v50 }
 0x212   : > { %3743 = vst [vmem:[%s6038_s20 + $0xd0] sm:$0xff] %v3707_v22  ;;  %v3705_v0 = vadd.f32 %v6032_v38, %v3662_v28  ;;  %v3665_v5 = vadd.f32 %v4606_v19, %v3351_v30  ;;  %v3296_v42 = vpop.f32.mrf.mxu1 }
 0x213   : > { %v3594_v54 = vpop.f32.mrf.mxu0  ;;  %v3353_v53 = vadd.f32 %v3296_v42, %v6016_v10 }
 0x214   : > { %3741 = vst [vmem:[%s6038_s20 + $0xc0] sm:$0xff] %v3705_v0  ;;  %v3708_v39 = vadd.f32 %v6032_v38, %v3665_v5  ;;  %v3663_v32 = vadd.f32 %v3594_v54, %v3349_v2  ;;  %v4575_v13 = vpop.f32.mrf.mxu1 }
 0x215   : > { %v4609_v1 = vpop.f32.mrf.mxu0  ;;  %v3358_v46 = vadd.f32 %v4575_v13, %v6019_v41 }
 0x216   : > { %3744 = vst [vmem:[%s6038_s20 + $0xd8] sm:$0xff] %v3708_v39  ;;  %v3706_v44 = vadd.f32 %v6032_v38, %v3663_v32  ;;  %v3668_v26 = vadd.f32 %v4609_v1, %v3354_v40  ;;  %v3309_v3 = vpop.f32.mrf.mxu1 }
 0x217   : > { %v3607_v24 = vpop.f32.mrf.mxu0  ;;  %v3356_v45 = vadd.f32 %v3309_v3, %v6021_v60 }
 0x218   : > { %3742 = vst [vmem:[%s6038_s20 + $0xc8] sm:$0xff] %v3706_v44  ;;  %v3711_v36 = vadd.f32 %v6032_v38, %v3668_v26  ;;  %v3666_v33 = vadd.f32 %v3607_v24, %v3352_v35  ;;  %v4576_v43 = vpop.f32.mrf.mxu1 }
 0x219   : > { %v4610_v21 = vpop.f32.mrf.mxu0  ;;  %v3359_v8 = vadd.f32 %v4576_v43, %v6023_v9 }
 0x21a   : > { %3747 = vst [vmem:[%s6038_s20 + $0xf0] sm:$0xff] %v3711_v36  ;;  %v3709_v14 = vadd.f32 %v6032_v38, %v3666_v33  ;;  %v3669_v57 = vadd.f32 %v4610_v21, %v3355_v29  ;;  %v3312_v49 = vpop.f32.mrf.mxu1 }
 0x21b   : > { %v3610_v61 = vpop.f32.mrf.mxu0  ;;  %v3357_v16 = vadd.f32 %v3312_v49, %v6027_v17 }
 0x21c   : > { %3745 = vst [vmem:[%s6038_s20 + $0xe0] sm:$0xff] %v3709_v14  ;;  %v3712_v50 = vadd.f32 %v6032_v38, %v3669_v57  ;;  %v3667_v48 = vadd.f32 %v3610_v61, %v3353_v53 }
 0x21d   : > { %v4613_v37 = vpop.f32.mrf.mxu0 }
 0x21e   : > { %3748 = vst [vmem:[%s6038_s20 + $0xf8] sm:$0xff] %v3712_v50  ;;  %v3710_v10 = vadd.f32 %v6032_v38, %v3667_v48  ;;  %v3672_v7 = vadd.f32 %v4613_v37, %v3358_v46 }
 0x21f   : > { %v3623_v34 = vpop.f32.mrf.mxu0 }
 0x220   : > { %3746 = vst [vmem:[%s6038_s20 + $0xe8] sm:$0xff] %v3710_v10  ;;  %v3715_v41 = vadd.f32 %v6032_v38, %v3672_v7  ;;  %v3670_v51 = vadd.f32 %v3623_v34, %v3356_v45 }
 0x221   : > { %v4614_v23 = vpop.f32.mrf.mxu0 }
 0x222   : > { %3751 = vst [vmem:[%s6038_s20 + $0x110] sm:$0xff] %v3715_v41  ;;  %v3713_v60 = vadd.f32 %v6032_v38, %v3670_v51  ;;  %v3673_v56 = vadd.f32 %v4614_v23, %v3359_v8 }
 0x223   : > { %v3626_v47 = vpop.f32.mrf.mxu0 }
 0x224   : > { %3749 = vst [vmem:[%s6038_s20 + $0x100] sm:$0xff] %v3713_v60  ;;  %v3716_v18 = vadd.f32 %v6032_v38, %v3673_v56  ;;  %v3671_v25 = vadd.f32 %v3626_v47, %v3357_v16 }
 0x226   : > { %3752 = vst [vmem:[%s6038_s20 + $0x118] sm:$0xff] %v3716_v18  ;;  %v3714_v20 = vadd.f32 %v6032_v38, %v3671_v25 }
 0x228   : > { %3750 = vst [vmem:[%s6038_s20 + $0x108] sm:$0xff] %v3714_v20 }
 0x229 PF: > { %s13_s14 = sadd.s32 1, %s4728_s14   ;;  %s6197_s12 = smov %s4724_s13 }
 0x22a   : > { %p10_p5 = scmp.ge.s32.totalorder %s13_s14, 4   ;;  %s6198_s13 = smov %s6200_s15 }
 0x22c   :  { %12 = sbr.rel (!%p10_p5) target bundleno = 2 (0x2), region = 76 }

</bundles_post_ra>
